<compile_context>
chip_gen: v7x
topology: tpu7x:2x2x1
jax: 0.10.0
libtpu: 0.0.40
codegen_flags: <defaults>
</compile_context>

<pallas_src>
import jax
import jax.numpy as jnp
from jax.experimental import pallas as pl
from jax.experimental.pallas import tpu as pltpu


def _round_up(x, m):
    return ((x + m - 1) // m) * m


def _pad2(a, rows, cols):
    r, c = a.shape
    if r == rows and c == cols:
        return a
    return jnp.pad(a, ((0, rows - r), (0, cols - c)))


def _vmem_info():
    """(physical_vmem_bytes, scoped_budget_bytes) — generation aware."""
    cap = 64 * 1024 * 1024                       # conservative fallback (v7x VMEM)
    try:
        cap = int(pltpu.get_tpu_info().vmem_capacity_bytes)
    except Exception:
        pass
    # ~3/4 of physical: ~96 MiB on 128-MiB chips (v5e/v6e), ~48 MiB on v7x.
    budget = max(32 * 1024 * 1024, min((cap // 4) * 3, 112 * 1024 * 1024))
    return cap, budget


def _choose_item_tile(n_items, h0_pad, w_bytes, budget):
    """Largest item tile whose double-buffered x / W0 tiles fit the budget."""
    items128 = _round_up(n_items, 128)
    bm_hint = 256
    for bk in (8192, 4096, 2048, 1024, 512, 256, 128):
        if bk > items128:
            continue
        need = 2 * bm_hint * bk * 4 + 2 * bk * h0_pad * w_bytes
        if need <= budget // 2:
            return bk
    return 128


def _choose_batch_tile(batch, bk, h0_pad, hd_pad, latent_pad,
                       w_bytes, x_bytes, out_bytes, budget, vmem_cap):
    """Large (256-aligned) batch tile so W0 / W_dec are streamed few times."""
    if batch <= 256:
        return _round_up(batch, 8)
    bm = 256
    for c in (1024, 768, 512, 256):
        if c > _round_up(batch, 256):
            continue
        # kernel A per-step VMEM: double-buffered x / W0 tiles + resident acc + outs
        need_a = (2 * c * bk * x_bytes + 2 * bk * h0_pad * w_bytes
                  + c * h0_pad * 4 + 2 * c * (2 * latent_pad + hd_pad) * 4)
        # kernel B per-step VMEM (all double-buffered)
        need_b = 2 * (c * hd_pad * 4 + hd_pad * bk * w_bytes
                      + bk * 4 + c * bk * out_bytes)
        if max(need_a, need_b) <= int(budget * 0.7):
            bm = c
            break
    # keep >= 2 batch tiles on 64-MiB-VMEM (2-TensorCore, v7x-class) chips so
    # both cores get work on the "parallel" batch axis
    if vmem_cap <= 64 * 1024 * 1024 and batch >= 512:
        bm = min(bm, max(256, (_round_up(batch, 512) // 2 // 256) * 256))
    return bm


# ---------------------------------------------------------------------------
# One-time parameter preparation (hoisted out of the forward pass)
# ---------------------------------------------------------------------------
def prepare_multivae_params(q_params, p_params, p_dims, *,
                            weight_dtype=jnp.bfloat16, item_tile=None):
    """Host-side weight prep.  Call ONCE; reuse the result across forwards.

    q_params / p_params : lists of (W, b) with W [in, out], b [1, out]
    p_dims              : decoder dims, e.g. [latent, hidden, n_items]
    """
    n_q, n_p = len(q_params), len(p_params)
    assert n_q >= 2 and n_p >= 2, "need at least [latent, hidden, n_items] dims"
    latent = p_dims[0]
    n_items = p_dims[-1]
    f32 = jnp.float32

    vmem_cap, vmem_budget = _vmem_info()
    w_dt = jnp.dtype(weight_dtype)
    w_bytes = w_dt.itemsize

    h0 = q_params[0][0].shape[1]          # first encoder layer output dim
    hd = p_params[-1][0].shape[0]         # last decoder layer input dim
    h0_pad = _round_up(h0, 128)
    hd_pad = _round_up(hd, 128)
    latent_pad = _round_up(latent, 128)

    if item_tile is None:
        bk = _choose_item_tile(n_items, h0_pad, w_bytes, vmem_budget)
    else:
        bk = min(_round_up(item_tile, 128), _round_up(n_items, 128))
    items_pad = _round_up(n_items, bk)

    def cvt(w, b, rows, cols):
        return (_pad2(w.astype(weight_dtype), rows, cols),
                _pad2(b.astype(f32).reshape(1, -1), 1, cols))

    # first encoder layer: pad K rows to items_pad, lanes to h0_pad
    w0, b0 = cvt(q_params[0][0], q_params[0][1], items_pad, h0_pad)

    # small VMEM-resident weights: enc mid, mu/logvar split, dec mid
    small = []
    for w, b in q_params[1:n_q - 1]:
        wp, bp = cvt(w, b, _round_up(w.shape[0], 128), _round_up(w.shape[1], 128))
        small += [wp, bp]
    w_ql, b_ql = q_params[n_q - 1]
    b_ql = b_ql.reshape(1, -1)
    d_in_pad = _round_up(w_ql.shape[0], 128)
    w_mu, b_mu = cvt(w_ql[:, :latent], b_ql[:, :latent], d_in_pad, latent_pad)
    w_lv, b_lv = cvt(w_ql[:, latent:], b_ql[:, latent:], d_in_pad, latent_pad)
    small += [w_mu, b_mu, w_lv, b_lv]
    for w, b in p_params[:n_p - 1]:
        wp, bp = cvt(w, b, _round_up(w.shape[0], 128), _round_up(w.shape[1], 128))
        small += [wp, bp]

    # last decoder layer: pad K rows to hd_pad, N cols to items_pad
    w_pl, b_pl = cvt(p_params[n_p - 1][0], p_params[n_p - 1][1], hd_pad, items_pad)

    return dict(
        w0=w0, b0=b0, small=tuple(small), w_pl=w_pl, b_pl=b_pl,
        n_enc_mid=n_q - 2, n_dec_mid=n_p - 1,
        n_items=n_items, items_pad=items_pad, bk=bk,
        latent=latent, latent_pad=latent_pad, h0_pad=h0_pad, hd_pad=hd_pad,
        weight_dtype=w_dt, vmem_cap=vmem_cap, vmem_budget=vmem_budget,
    )


# ---------------------------------------------------------------------------
# Kernel A: fused (L2-normalize + first encoder layer, K-tiled over n_items)
#           with all small middle layers in the final-K epilogue.
# ---------------------------------------------------------------------------
def _make_fused_encoder_kernel(n_enc_mid, n_dec_mid):
    n_small = 2 * n_enc_mid + 4 + 2 * n_dec_mid
    n_in = 3 + n_small

    def kernel(*refs):
        x_ref, w0_ref, b0_ref = refs[0], refs[1], refs[2]
        small = refs[3:3 + n_small]
        mu_ref, lv_ref, h2_ref = refs[n_in], refs[n_in + 1], refs[n_in + 2]
        acc_ref, sumsq_ref = refs[n_in + 3], refs[n_in + 4]

        k = pl.program_id(1)

        @pl.when(k == 0)
        def _():
            acc_ref[...] = jnp.zeros_like(acc_ref)
            sumsq_ref[...] = jnp.zeros_like(sumsq_ref)

        x = x_ref[...]
        xf = x.astype(jnp.float32)
        sumsq_ref[...] += jnp.sum(xf * xf, axis=-1, keepdims=True)
        w0 = w0_ref[...]
        acc_ref[...] += jnp.dot(x.astype(w0.dtype), w0,
                                preferred_element_type=jnp.float32)

        @pl.when(k == pl.num_programs(1) - 1)
        def _():
            # F.normalize: x / max(||x||, 1e-12) == x * rsqrt(max(sum x^2, 1e-24)),
            # folded in after the matmul.  Dropout is identity in eval mode.
            inv_norm = jax.lax.rsqrt(jnp.maximum(sumsq_ref[...], 1e-24))
            h = jnp.tanh(acc_ref[...] * inv_norm + b0_ref[...])
            idx = 0
            for _ in range(n_enc_mid):
                w = small[idx][...]
                b = small[idx + 1][...]
                idx += 2
                h = jnp.tanh(jnp.dot(h.astype(w.dtype), w,
                                     preferred_element_type=jnp.float32) + b)
            w_mu = small[idx][...]
            b_mu = small[idx + 1][...]
            w_lv = small[idx + 2][...]
            b_lv = small[idx + 3][...]
            idx += 4
            hc = h.astype(w_mu.dtype)
            mu = jnp.dot(hc, w_mu, preferred_element_type=jnp.float32) + b_mu
            logvar = jnp.dot(hc, w_lv, preferred_element_type=jnp.float32) + b_lv
            h = mu                                  # eval-mode reparameterize
            for _ in range(n_dec_mid):
                w = small[idx][...]
                b = small[idx + 1][...]
                idx += 2
                h = jnp.tanh(jnp.dot(h.astype(w.dtype), w,
                                     preferred_element_type=jnp.float32) + b)
            mu_ref[...] = mu
            lv_ref[...] = logvar
            h2_ref[...] = h

    return kernel


# ---------------------------------------------------------------------------
# Kernel B: last decoder layer, items-outer grid (each weight tile DMA'd once).
# ---------------------------------------------------------------------------
def _dec_last_kernel(h_ref, w_ref, b_ref, o_ref):
    h = h_ref[...]
    w = w_ref[...]
    o_ref[...] = (jnp.dot(h.astype(w.dtype), w,
                          preferred_element_type=jnp.float32)
                  + b_ref[...]).astype(o_ref.dtype)


# ---------------------------------------------------------------------------
# Forward pass (wrap `lambda x: multivae_forward(x, prep)` in jax.jit to serve)
# ---------------------------------------------------------------------------
def multivae_forward(x, prep, *, batch_tile=None,
                     input_dtype=jnp.float32, logits_dtype=jnp.float32):
    """MultiVAE eval-mode forward.  x: [batch, n_items] -> (logits, mu, logvar)."""
    f32 = jnp.float32
    batch, n_items = x.shape
    assert n_items == prep["n_items"]

    bk = prep["bk"]
    items_pad = prep["items_pad"]
    h0_pad, hd_pad = prep["h0_pad"], prep["hd_pad"]
    latent, latent_pad = prep["latent"], prep["latent_pad"]
    w_bytes = prep["weight_dtype"].itemsize
    vmem_cap, vmem_budget = prep["vmem_cap"], prep["vmem_budget"]

    x_bytes = jnp.dtype(input_dtype).itemsize
    out_bytes = jnp.dtype(logits_dtype).itemsize
    sub32 = x_bytes < 4 or out_bytes < 4
    align = 16 if sub32 else 8                  # sub-32-bit dtypes pack 2 sublanes

    if batch_tile is None:
        bm = _choose_batch_tile(batch, bk, h0_pad, hd_pad, latent_pad,
                                w_bytes, x_bytes, out_bytes,
                                vmem_budget, vmem_cap)
    else:
        bm = min(_round_up(batch_tile, align), _round_up(batch, align))
    bm = _round_up(bm, align)
    b_pad = _round_up(batch, bm)
    n_bm = b_pad // bm
    n_k = items_pad // bk

    # pad / cast x only when needed (skip full-array HBM round trips if aligned)
    x_p = x
    if x_p.dtype != jnp.dtype(input_dtype):
        x_p = x_p.astype(input_dtype)
    if b_pad != batch or items_pad != n_items:
        x_p = jnp.pad(x_p, ((0, b_pad - batch), (0, items_pad - n_items)))

    w0, b0, small = prep["w0"], prep["b0"], prep["small"]
    w_pl, b_pl = prep["w_pl"], prep["b_pl"]

    # ---- Kernel A ----------------------------------------------------------
    in_specs = [
        pl.BlockSpec((bm, bk), lambda i, k: (i, k)),        # x tile
        pl.BlockSpec((bk, h0_pad), lambda i, k: (k, 0)),    # W0 tile (K-tiled)
        pl.BlockSpec((1, h0_pad), lambda i, k: (0, 0)),     # b0
    ]
    for a in small:                                          # constant-index -> DMA'd once
        in_specs.append(pl.BlockSpec(a.shape, lambda i, k: (0, 0)))

    small_bytes = sum(int(a.size) * a.dtype.itemsize for a in small)
    cost_a = pl.CostEstimate(
        flops=2 * b_pad * items_pad * h0_pad,
        transcendentals=2 * b_pad * h0_pad,
        bytes_accessed=(int(x_p.size) * x_p.dtype.itemsize
                        + n_bm * int(w0.size) * w0.dtype.itemsize
                        + small_bytes
                        + b_pad * (2 * latent_pad + hd_pad) * 4))

    mu_pad, logvar_pad, h2 = pl.pallas_call(
        _make_fused_encoder_kernel(prep["n_enc_mid"], prep["n_dec_mid"]),
        out_shape=(jax.ShapeDtypeStruct((b_pad, latent_pad), f32),
                   jax.ShapeDtypeStruct((b_pad, latent_pad), f32),
                   jax.ShapeDtypeStruct((b_pad, hd_pad), f32)),
        grid=(n_bm, n_k),
        in_specs=in_specs,
        out_specs=(pl.BlockSpec((bm, latent_pad), lambda i, k: (i, 0)),
                   pl.BlockSpec((bm, latent_pad), lambda i, k: (i, 0)),
                   pl.BlockSpec((bm, hd_pad), lambda i, k: (i, 0))),
        scratch_shapes=[pltpu.VMEM((bm, h0_pad), jnp.float32),
                        pltpu.VMEM((bm, 1), jnp.float32)],
        compiler_params=pltpu.CompilerParams(
            dimension_semantics=("parallel", "arbitrary"),
            vmem_limit_bytes=vmem_budget),
        cost_estimate=cost_a,
    )(x_p, w0, b0, *small)

    # ---- Kernel B ----------------------------------------------------------
    n_j = items_pad // bk
    cost_b = pl.CostEstimate(
        flops=2 * b_pad * hd_pad * items_pad,
        transcendentals=0,
        bytes_accessed=(int(w_pl.size) * w_pl.dtype.itemsize
                        + n_j * b_pad * hd_pad * 4
                        + items_pad * 4
                        + b_pad * items_pad * out_bytes))
    # TODO(synk): if profiling shows a DMA bubble at each outer items-tile
    #             boundary, add pipeline_mode=pl.Buffered(3) to the W spec.
    logits_pad = pl.pallas_call(
        _dec_last_kernel,
        out_shape=jax.ShapeDtypeStruct((b_pad, items_pad), logits_dtype),
        grid=(n_j, n_bm),                 # items OUTER: weight tile streamed once
        in_specs=[
            pl.BlockSpec((bm, hd_pad), lambda j, i: (i, 0)),
            pl.BlockSpec((hd_pad, bk), lambda j, i: (0, j)),
            pl.BlockSpec((1, bk), lambda j, i: (0, j)),
        ],
        out_specs=pl.BlockSpec((bm, bk), lambda j, i: (i, j)),
        compiler_params=pltpu.CompilerParams(
            dimension_semantics=("parallel", "parallel"),
            vmem_limit_bytes=vmem_budget),
        cost_estimate=cost_b,
    )(h2, w_pl, b_pl)

    logits = logits_pad
    if b_pad != batch or items_pad != n_items:
        logits = logits[:batch, :n_items]
    if b_pad != batch or latent_pad != latent:
        mu = mu_pad[:batch, :latent]
        logvar = logvar_pad[:batch, :latent]
    else:
        mu, logvar = mu_pad, logvar_pad
    return logits, mu, logvar


# ---------------------------------------------------------------------------
# Init (matches MultiVAE.init_weights) and pure-JAX reference
# ---------------------------------------------------------------------------
def init_params(key, p_dims):
    """weight ~ N(0, sqrt(2/(fan_in+fan_out))), bias ~ N(0, 0.001).
    Weights returned as [in, out] (transposed vs. PyTorch's [out, in])."""
    q_dims = p_dims[::-1]
    temp_q_dims = q_dims[:-1] + [q_dims[-1] * 2]

    def make_layers(dims, key):
        params = []
        for d_in, d_out in zip(dims[:-1], dims[1:]):
            key, kw, kb = jax.random.split(key, 3)
            std = jnp.sqrt(2.0 / (d_in + d_out))
            w = jax.random.normal(kw, (d_in, d_out), jnp.float32) * std
            b = jax.random.normal(kb, (1, d_out), jnp.float32) * 0.001
            params.append((w, b))
        return params, key

    q_params, key = make_layers(temp_q_dims, key)
    p_params, key = make_layers(p_dims, key)
    return q_params, p_params


def multivae_reference(x, q_params, p_params, p_dims):
    """Pure-JAX f32 reference (eval mode)."""
    def dot(a, b):
        return jnp.dot(a, b, precision=jax.lax.Precision.HIGHEST)

    latent = p_dims[0]
    norm = jnp.sqrt(jnp.sum(x * x, axis=-1, keepdims=True))
    h = x / jnp.maximum(norm, 1e-12)
    n_q = len(q_params)
    for i, (w, b) in enumerate(q_params):
        h = dot(h, w) + b
        if i != n_q - 1:
            h = jnp.tanh(h)
    mu, logvar = h[:, :latent], h[:, latent:]
    h = mu
    n_p = len(p_params)
    for i, (w, b) in enumerate(p_params):
        h = dot(h, w) + b
        if i != n_p - 1:
            h = jnp.tanh(h)
    return h, mu, logvar


if __name__ == "__main__":
    key = jax.random.PRNGKey(0)

    # --- test 1: lane-aligned small shapes, f32 weight path -----------------
    p_dims = [128, 256, 512]          # [latent, hidden, n_items]
    batch = 64
    key, kx, kp = jax.random.split(key, 3)
    x = jnp.abs(jax.random.normal(kx, (batch, p_dims[-1]), jnp.float32))
    q_params, p_params = init_params(kp, p_dims)
    ref = multivae_reference(x, q_params, p_params, p_dims)

    prep_f32 = prepare_multivae_params(q_params, p_params, p_dims,
                                       weight_dtype=jnp.float32, item_tile=256)
    out_f32 = multivae_forward(x, prep_f32)
    jax.block_until_ready(out_f32)
    for got, want in zip(out_f32, ref):
        assert got.shape == want.shape, (got.shape, want.shape)
        # in-kernel matmuls use default MXU precision vs HIGHEST reference,
        # so tolerance is modest rather than exact.
        assert jnp.allclose(got, want, atol=3e-4, rtol=3e-4), \
            float(jnp.max(jnp.abs(got - want)))

    # --- test 2: bf16 weight / input / logits streaming path ----------------
    prep_bf16 = prepare_multivae_params(q_params, p_params, p_dims,
                                        weight_dtype=jnp.bfloat16, item_tile=256)
    out_bf16 = multivae_forward(x, prep_bf16,
                                input_dtype=jnp.bfloat16,
                                logits_dtype=jnp.bfloat16)
    jax.block_until_ready(out_bf16)
    for got, want in zip(out_bf16, ref):
        assert got.shape == want.shape, (got.shape, want.shape)
        g = got.astype(jnp.float32)
        assert jnp.allclose(g, want, atol=2e-2, rtol=1e-1), \
            float(jnp.max(jnp.abs(g - want)))

    # --- test 3: unaligned dims + deeper stack exercising the padding path --
    p_dims2 = [32, 48, 96, 300]
    batch2 = 20
    key, kx2, kp2 = jax.random.split(key, 3)
    x2 = jnp.abs(jax.random.normal(kx2, (batch2, p_dims2[-1]), jnp.float32))
    q_params2, p_params2 = init_params(kp2, p_dims2)
    ref2 = multivae_reference(x2, q_params2, p_params2, p_dims2)
    prep2 = prepare_multivae_params(q_params2, p_params2, p_dims2,
                                    weight_dtype=jnp.float32, item_tile=128)
    out2 = multivae_forward(x2, prep2)
    jax.block_until_ready(out2)
    for got, want in zip(out2, ref2):
        assert got.shape == want.shape, (got.shape, want.shape)
        assert jnp.allclose(got, want, atol=3e-4, rtol=3e-4), \
            float(jnp.max(jnp.abs(got - want)))

    print("KERNEL_OK")
</pallas_src>

<mosaic_0001>
module attributes {stable_mosaic.version = 11 : i64} {
  func.func @kernel(%arg0: i32, %arg1: i32, %arg2: memref<64x256xf32, #tpu.memory_space<vmem>>, %arg3: memref<256x256xf32, #tpu.memory_space<vmem>>, %arg4: memref<1x256xf32, #tpu.memory_space<vmem>>, %arg5: memref<256x128xf32, #tpu.memory_space<vmem>>, %arg6: memref<1x128xf32, #tpu.memory_space<vmem>>, %arg7: memref<256x128xf32, #tpu.memory_space<vmem>>, %arg8: memref<1x128xf32, #tpu.memory_space<vmem>>, %arg9: memref<128x256xf32, #tpu.memory_space<vmem>>, %arg10: memref<1x256xf32, #tpu.memory_space<vmem>>, %arg11: memref<64x128xf32, #tpu.memory_space<vmem>>, %arg12: memref<64x128xf32, #tpu.memory_space<vmem>>, %arg13: memref<64x256xf32, #tpu.memory_space<vmem>>, %arg14: memref<64x256xf32, #tpu.memory_space<vmem>>, %arg15: memref<64x1xf32, #tpu.memory_space<vmem>>) attributes {dimension_semantics = [#tpu.dimension_semantics<parallel>, #tpu.dimension_semantics<arbitrary>], iteration_bounds = array<i64: 1, 2>, scalar_prefetch = 0 : i64, scratch_operands = 2 : i64, tpu.core_type = #tpu.core_type<tc>, window_params = [{transform_indices = @transform_0, window_bounds = array<i64: 64, 256>}, {transform_indices = @transform_1, window_bounds = array<i64: 256, 256>}, {pipeline_mode = #tpu.pipeline_mode<synchronous>, transform_indices = @transform_2, window_bounds = array<i64: 1, 256>}, {pipeline_mode = #tpu.pipeline_mode<synchronous>, transform_indices = @transform_3, window_bounds = array<i64: 256, 128>}, {pipeline_mode = #tpu.pipeline_mode<synchronous>, transform_indices = @transform_4, window_bounds = array<i64: 1, 128>}, {pipeline_mode = #tpu.pipeline_mode<synchronous>, transform_indices = @transform_5, window_bounds = array<i64: 256, 128>}, {pipeline_mode = #tpu.pipeline_mode<synchronous>, transform_indices = @transform_6, window_bounds = array<i64: 1, 128>}, {pipeline_mode = #tpu.pipeline_mode<synchronous>, transform_indices = @transform_7, window_bounds = array<i64: 128, 256>}, {pipeline_mode = #tpu.pipeline_mode<synchronous>, transform_indices = @transform_8, window_bounds = array<i64: 1, 256>}, {transform_indices = @transform_9, window_bounds = array<i64: 64, 128>}, {transform_indices = @transform_10, window_bounds = array<i64: 64, 128>}, {transform_indices = @transform_11, window_bounds = array<i64: 64, 256>}]} {
    %c0_i32 = arith.constant 0 : i32
    %0 = arith.cmpi eq, %arg1, %c0_i32 : i32
    %1 = arith.extui %0 : i1 to i32
    %c0_i32_0 = arith.constant 0 : i32
    %2 = arith.cmpi ne, %1, %c0_i32_0 : i32
    scf.if %2 {
      %cst_14 = arith.constant 0.000000e+00 : f32
      %18 = vector.broadcast %cst_14 : f32 to vector<64x256xf32>
      %c0_15 = arith.constant 0 : index
      %c0_16 = arith.constant 0 : index
      %19 = vector.load %arg14[%c0_15, %c0_16] : memref<64x256xf32, #tpu.memory_space<vmem>>, vector<64x256xf32>
      tpu.vector_store %arg14[%c0_15, %c0_16], %18 {strides = array<i32>} : memref<64x256xf32, #tpu.memory_space<vmem>>, vector<64x256xf32>,
      %cst_17 = arith.constant 0.000000e+00 : f32
      %20 = vector.broadcast %cst_17 : f32 to vector<64x1xf32>
      %c0_18 = arith.constant 0 : index
      %c0_19 = arith.constant 0 : index
      %21 = vector.load %arg15[%c0_18, %c0_19] : memref<64x1xf32, #tpu.memory_space<vmem>>, vector<64x1xf32>
      tpu.vector_store %arg15[%c0_18, %c0_19], %20 {strides = array<i32>} : memref<64x1xf32, #tpu.memory_space<vmem>>, vector<64x1xf32>,
    } else {
    }
    %c0 = arith.constant 0 : index
    %c0_1 = arith.constant 0 : index
    %3 = vector.load %arg2[%c0, %c0_1] : memref<64x256xf32, #tpu.memory_space<vmem>>, vector<64x256xf32>
    %c0_2 = arith.constant 0 : index
    %c0_3 = arith.constant 0 : index
    %4 = vector.load %arg15[%c0_2, %c0_3] : memref<64x1xf32, #tpu.memory_space<vmem>>, vector<64x1xf32>
    %5 = arith.mulf %3, %3 : vector<64x256xf32>
    %cst = arith.constant dense<0.000000e+00> : vector<64xf32>
    %6 = vector.multi_reduction <add>, %5, %cst [1] : vector<64x256xf32> to vector<64xf32>
    %7 = vector.shape_cast %6 : vector<64xf32> to vector<64x1xf32>
    %8 = arith.addf %4, %7 : vector<64x1xf32>
    %c0_4 = arith.constant 0 : index
    %c0_5 = arith.constant 0 : index
    %9 = vector.load %arg15[%c0_4, %c0_5] : memref<64x1xf32, #tpu.memory_space<vmem>>, vector<64x1xf32>
    tpu.vector_store %arg15[%c0_4, %c0_5], %8 {strides = array<i32>} : memref<64x1xf32, #tpu.memory_space<vmem>>, vector<64x1xf32>,
    %c0_6 = arith.constant 0 : index
    %c0_7 = arith.constant 0 : index
    %10 = vector.load %arg3[%c0_6, %c0_7] : memref<256x256xf32, #tpu.memory_space<vmem>>, vector<256x256xf32>
    %c0_8 = arith.constant 0 : index
    %c0_9 = arith.constant 0 : index
    %11 = vector.load %arg14[%c0_8, %c0_9] : memref<64x256xf32, #tpu.memory_space<vmem>>, vector<64x256xf32>
    %cst_10 = arith.constant dense<0.000000e+00> : vector<64x256xf32>
    %12 = tpu.matmul %3, %10, %cst_10 {dimension_numbers = #tpu.dot_dimension_numbers<[1], [0], [0], [1], [0, 0, 1, 1], [], []>} : vector<64x256xf32>, vector<256x256xf32>, vector<64x256xf32> -> vector<64x256xf32>
    %13 = arith.addf %11, %12 : vector<64x256xf32>
    %c0_11 = arith.constant 0 : index
    %c0_12 = arith.constant 0 : index
    %14 = vector.load %arg14[%c0_11, %c0_12] : memref<64x256xf32, #tpu.memory_space<vmem>>, vector<64x256xf32>
    tpu.vector_store %arg14[%c0_11, %c0_12], %13 {strides = array<i32>} : memref<64x256xf32, #tpu.memory_space<vmem>>, vector<64x256xf32>,
    %c1_i32 = arith.constant 1 : i32
    %15 = arith.cmpi eq, %arg1, %c1_i32 : i32
    %16 = arith.extui %15 : i1 to i32
    %c0_i32_13 = arith.constant 0 : i32
    %17 = arith.cmpi ne, %16, %c0_i32_13 : i32
    scf.if %17 {
      %c0_14 = arith.constant 0 : index
      %c0_15 = arith.constant 0 : index
      %18 = vector.load %arg15[%c0_14, %c0_15] : memref<64x1xf32, #tpu.memory_space<vmem>>, vector<64x1xf32>
      %cst_16 = arith.constant 1.000000e-24 : f32
      %19 = vector.broadcast %cst_16 : f32 to vector<64x1xf32>
      %20 = arith.maximumf %18, %19 : vector<64x1xf32>
      %21 = math.rsqrt %20 : vector<64x1xf32>
      %c0_17 = arith.constant 0 : index
      %c0_18 = arith.constant 0 : index
      %22 = vector.load %arg14[%c0_17, %c0_18] : memref<64x256xf32, #tpu.memory_space<vmem>>, vector<64x256xf32>
      %23 = vector.broadcast %21 : vector<64x1xf32> to vector<64x256xf32>
      %24 = arith.mulf %22, %23 : vector<64x256xf32>
      %c0_19 = arith.constant 0 : index
      %c0_20 = arith.constant 0 : index
      %25 = vector.load %arg4[%c0_19, %c0_20] : memref<1x256xf32, #tpu.memory_space<vmem>>, vector<1x256xf32>
      %26 = vector.broadcast %25 : vector<1x256xf32> to vector<64x256xf32>
      %27 = arith.addf %24, %26 : vector<64x256xf32>
      %28 = math.tanh %27 : vector<64x256xf32>
      %c0_21 = arith.constant 0 : index
      %c0_22 = arith.constant 0 : index
      %29 = vector.load %arg5[%c0_21, %c0_22] : memref<256x128xf32, #tpu.memory_space<vmem>>, vector<256x128xf32>
      %c0_23 = arith.constant 0 : index
      %c0_24 = arith.constant 0 : index
      %30 = vector.load %arg6[%c0_23, %c0_24] : memref<1x128xf32, #tpu.memory_space<vmem>>, vector<1x128xf32>
      %c0_25 = arith.constant 0 : index
      %c0_26 = arith.constant 0 : index
      %31 = vector.load %arg7[%c0_25, %c0_26] : memref<256x128xf32, #tpu.memory_space<vmem>>, vector<256x128xf32>
      %c0_27 = arith.constant 0 : index
      %c0_28 = arith.constant 0 : index
      %32 = vector.load %arg8[%c0_27, %c0_28] : memref<1x128xf32, #tpu.memory_space<vmem>>, vector<1x128xf32>
      %cst_29 = arith.constant dense<0.000000e+00> : vector<64x128xf32>
      %33 = tpu.matmul %28, %29, %cst_29 {dimension_numbers = #tpu.dot_dimension_numbers<[1], [0], [0], [1], [0, 0, 1, 1], [], []>} : vector<64x256xf32>, vector<256x128xf32>, vector<64x128xf32> -> vector<64x128xf32>
      %34 = vector.broadcast %30 : vector<1x128xf32> to vector<64x128xf32>
      %35 = arith.addf %33, %34 : vector<64x128xf32>
      %cst_30 = arith.constant dense<0.000000e+00> : vector<64x128xf32>
      %36 = tpu.matmul %28, %31, %cst_30 {dimension_numbers = #tpu.dot_dimension_numbers<[1], [0], [0], [1], [0, 0, 1, 1], [], []>} : vector<64x256xf32>, vector<256x128xf32>, vector<64x128xf32> -> vector<64x128xf32>
      %37 = vector.broadcast %32 : vector<1x128xf32> to vector<64x128xf32>
      %38 = arith.addf %36, %37 : vector<64x128xf32>
      %c0_31 = arith.constant 0 : index
      %c0_32 = arith.constant 0 : index
      %39 = vector.load %arg9[%c0_31, %c0_32] : memref<128x256xf32, #tpu.memory_space<vmem>>, vector<128x256xf32>
      %c0_33 = arith.constant 0 : index
      %c0_34 = arith.constant 0 : index
      %40 = vector.load %arg10[%c0_33, %c0_34] : memref<1x256xf32, #tpu.memory_space<vmem>>, vector<1x256xf32>
      %cst_35 = arith.constant dense<0.000000e+00> : vector<64x256xf32>
      %41 = tpu.matmul %35, %39, %cst_35 {dimension_numbers = #tpu.dot_dimension_numbers<[1], [0], [0], [1], [0, 0, 1, 1], [], []>} : vector<64x128xf32>, vector<128x256xf32>, vector<64x256xf32> -> vector<64x256xf32>
      %42 = vector.broadcast %40 : vector<1x256xf32> to vector<64x256xf32>
      %43 = arith.addf %41, %42 : vector<64x256xf32>
      %44 = math.tanh %43 : vector<64x256xf32>
      %c0_36 = arith.constant 0 : index
      %c0_37 = arith.constant 0 : index
      %45 = vector.load %arg11[%c0_36, %c0_37] : memref<64x128xf32, #tpu.memory_space<vmem>>, vector<64x128xf32>
      tpu.vector_store %arg11[%c0_36, %c0_37], %35 {strides = array<i32>} : memref<64x128xf32, #tpu.memory_space<vmem>>, vector<64x128xf32>,
      %c0_38 = arith.constant 0 : index
      %c0_39 = arith.constant 0 : index
      %46 = vector.load %arg12[%c0_38, %c0_39] : memref<64x128xf32, #tpu.memory_space<vmem>>, vector<64x128xf32>
      tpu.vector_store %arg12[%c0_38, %c0_39], %38 {strides = array<i32>} : memref<64x128xf32, #tpu.memory_space<vmem>>, vector<64x128xf32>,
      %c0_40 = arith.constant 0 : index
      %c0_41 = arith.constant 0 : index
      %47 = vector.load %arg13[%c0_40, %c0_41] : memref<64x256xf32, #tpu.memory_space<vmem>>, vector<64x256xf32>
      tpu.vector_store %arg13[%c0_40, %c0_41], %44 {strides = array<i32>} : memref<64x256xf32, #tpu.memory_space<vmem>>, vector<64x256xf32>,
    } else {
    }
    return
  }
  func.func @transform_0(%arg0: i32, %arg1: i32) -> (i32, i32) {
    %c0_i32 = arith.constant 0 : i32
    return %arg0, %arg1 : i32, i32
  }
  func.func @transform_1(%arg0: i32, %arg1: i32) -> (i32, i32) {
    %c0_i32 = arith.constant 0 : i32
    %c0_i32_0 = arith.constant 0 : i32
    return %arg1, %c0_i32 : i32, i32
  }
  func.func @transform_2(%arg0: i32, %arg1: i32) -> (i32, i32) {
    %c0_i32 = arith.constant 0 : i32
    %c0_i32_0 = arith.constant 0 : i32
    %c0_i32_1 = arith.constant 0 : i32
    return %c0_i32, %c0_i32_0 : i32, i32
  }
  func.func @transform_3(%arg0: i32, %arg1: i32) -> (i32, i32) {
    %c0_i32 = arith.constant 0 : i32
    %c0_i32_0 = arith.constant 0 : i32
    %c0_i32_1 = arith.constant 0 : i32
    return %c0_i32, %c0_i32_0 : i32, i32
  }
  func.func @transform_4(%arg0: i32, %arg1: i32) -> (i32, i32) {
    %c0_i32 = arith.constant 0 : i32
    %c0_i32_0 = arith.constant 0 : i32
    %c0_i32_1 = arith.constant 0 : i32
    return %c0_i32, %c0_i32_0 : i32, i32
  }
  func.func @transform_5(%arg0: i32, %arg1: i32) -> (i32, i32) {
    %c0_i32 = arith.constant 0 : i32
    %c0_i32_0 = arith.constant 0 : i32
    %c0_i32_1 = arith.constant 0 : i32
    return %c0_i32, %c0_i32_0 : i32, i32
  }
  func.func @transform_6(%arg0: i32, %arg1: i32) -> (i32, i32) {
    %c0_i32 = arith.constant 0 : i32
    %c0_i32_0 = arith.constant 0 : i32
    %c0_i32_1 = arith.constant 0 : i32
    return %c0_i32, %c0_i32_0 : i32, i32
  }
  func.func @transform_7(%arg0: i32, %arg1: i32) -> (i32, i32) {
    %c0_i32 = arith.constant 0 : i32
    %c0_i32_0 = arith.constant 0 : i32
    %c0_i32_1 = arith.constant 0 : i32
    return %c0_i32, %c0_i32_0 : i32, i32
  }
  func.func @transform_8(%arg0: i32, %arg1: i32) -> (i32, i32) {
    %c0_i32 = arith.constant 0 : i32
    %c0_i32_0 = arith.constant 0 : i32
    %c0_i32_1 = arith.constant 0 : i32
    return %c0_i32, %c0_i32_0 : i32, i32
  }
  func.func @transform_9(%arg0: i32, %arg1: i32) -> (i32, i32) {
    %c0_i32 = arith.constant 0 : i32
    %c0_i32_0 = arith.constant 0 : i32
    return %arg0, %c0_i32 : i32, i32
  }
  func.func @transform_10(%arg0: i32, %arg1: i32) -> (i32, i32) {
    %c0_i32 = arith.constant 0 : i32
    %c0_i32_0 = arith.constant 0 : i32
    return %arg0, %c0_i32 : i32, i32
  }
  func.func @transform_11(%arg0: i32, %arg1: i32) -> (i32, i32) {
    %c0_i32 = arith.constant 0 : i32
    %c0_i32_0 = arith.constant 0 : i32
    return %arg0, %c0_i32 : i32, i32
  }
}

</mosaic_0001>

<bundles_post_ra>
// kernel: tpu_custom_call.1
= control target key start
LH: loop header
LB: loop body
LE: loop exit
PB: predicated region body
PF: predicated region fallthrough
CT: control target
= control target key end

     0   :  { %s3195_s0 = inlined_call_operand.hbm [shape: f32[64,512], index: 0, kind: input, shape index: {}]   ;;  %s3196_s1 = inlined_call_operand.hbm [shape: f32[512,256], index: 1, kind: input, shape index: {}]   ;;  %s3197_s2 = inlined_call_operand.vmem [shape: f32[1,256], index: 2, kind: input, shape index: {}]   ;;  %s3198_s3 = inlined_call_operand.hbm [shape: f32[256,128], index: 3, kind: input, shape index: {}]   ;;  %s3199_s4 = inlined_call_operand.vmem [shape: f32[1,128], index: 4, kind: input, shape index: {}]   ;;  %s3200_s5 = inlined_call_operand.hbm [shape: f32[256,128], index: 5, kind: input, shape index: {}]   ;;  %s3201_s6 = inlined_call_operand.vmem [shape: f32[1,128], index: 6, kind: input, shape index: {}]   ;;  %s3202_s7 = inlined_call_operand.hbm [shape: f32[128,256], index: 7, kind: input, shape index: {}]   ;;  %s3203_s8 = inlined_call_operand.vmem [shape: f32[1,256], index: 8, kind: input, shape index: {}]   ;;  %s3204_s9 = inlined_call_operand.hbm [shape: f32[64,128], index: 9, kind: output, shape index: {0}]   ;;  %s3205_s10 = inlined_call_operand.hbm [shape: f32[64,128], index: 10, kind: output, shape index: {1}]   ;;  %s3206_s11 = inlined_call_operand.hbm [shape: f32[64,256], index: 11, kind: output, shape index: {2}]  }
   0x1   :  { %3214 = sst [smem:[#allocation23_spill]] %s3195_s0 }
   0x2   :  { %3215 = sst [smem:[#allocation24_spill]] %s3198_s3 }
   0x3   :  { %3216 = sst [smem:[#allocation25_spill]] %s3200_s5 }
   0x4   :  { %3217 = sst [smem:[#allocation26_spill]] %s3201_s6 }
   0x5   :  { %3218 = sst [smem:[#allocation27_spill]] %s3203_s8 }
   0x6   :  { %3219 = sst [smem:[#allocation28_spill]] %s3204_s9 }
   0x7   :  { %3220 = sst [smem:[#allocation29_spill]] %s3205_s10 }
   0x8   :  { %3221 = sst [smem:[#allocation30_spill]] %s3206_s11 }
   0x9   :  { %17 = vsyncpa [#allocation5], 0 }
   0xa   :  { %19 = vsyncpa [#allocation5 + $0x1], 0 }
   0xb   :  { %20 = vsyncpa [#allocation8], 0 }
   0xc   :  { %22 = vsyncpa [#allocation8 + $0x1], 0 }
   0xd   :  { %23 = vsyncpa [#allocation11], 0 }
   0xe   :  { %24 = vsyncpa [#allocation6], 0 }
   0xf   :  { %25 = vsyncpa [#allocation15], 0  ;;  %s2602_s17 = smov 0   ;;  %s2604_s18 = smov 0  }
  0x10   :  { %s2606_s19 = smov 0   ;;  %s2608_s20 = smov 0  }
  0x11   :  { %s2610_s21 = smov 0   ;;  %s2612_s22 = smov 0  }
  0x12 LB: > { %s2631_s23 = sadd.s32 4294967295, %s2520_s22   ;;  %p59_p0 = scmp.ne.s32.totalorder %s2508_s19, %s2504_s18  ;;  %s2520_s22 = sphi %s2612_s22, %s31_s22   ;;  %s2516_s21 = sphi %s2610_s21, %s3249_s21   ;;  %s2512_s20 = sphi %s2608_s20, %s3248_s20   ;;  %s2508_s19 = sphi %s2606_s19, %s3247_s19   ;;  %s2504_s18 = sphi %s2604_s18, %s3246_s18   ;;  %s2500_s17 = sphi %s2602_s17, %s3245_s17  }
  0x13   : > { %p60_p1 = scmp.eq.s32.totalorder %s2520_s22, 0  ;;  %p65_p2 = scmp.ne.s32.totalorder %s2504_s18, %s2500_s17 }
  0x14   : > { %p3208_p3 = scmp.eq.s32.totalorder %s2631_s23, 0  ;;  %p1669_p5 = scmp.ge.s32.totalorder %s2520_s22, 1 }
  0x15   : > { %p61_p4 = por %p60_p1, %p59_p0  ;;  %p327_p7 = scmp.lt.s32.totalorder %s2520_s22, 3 }
  0x16   : > { %p2642_p6 = por %p3208_p3, %p65_p2  ;;  %s2522_s27 = smov [#allocation9]  }
  0x17   : > { %p2647_p8 = pnand %p1669_p5, %p327_p7  ;;  %s342_s28 = sshll.u32 %s2522_s27, 4  ;;  %s2651_s28 = int_to_ptr.vmem [resolvable:$true] %s342_s28 }
  0x18   : > { %s3222_s25 = scalar_select %p2642_p6, 1, 0 }
  0x19   : > { %s3223_s26 = scalar_select %p2647_p8, 1, 0 }
  0x1a   : > { %p2050_p9 = pneg %p2647_p8  ;;  %p2070_p10 = scmp.lt.s32.totalorder %s2520_s22, 2 }
  0x1b   : > { %s2523_s12 = smov [#allocation10]   ;;  %s3226_s3 = sld [smem:[#allocation24_spill]] }
  0x1c   : > { %p2658_p11 = pnand %p2050_p9, %p3208_p3  ;;  %p2662_p12 = pnand %p2070_p10, %p61_p4 }
  0x1d   : > { %s358_s13 = sshll.u32 %s2523_s12, 4  ;;  %s2666_s13 = int_to_ptr.vmem [resolvable:$true] %s358_s13 }
  0x1e   : > { %s3225_s30 = scalar_select %p2662_p12, 1, 0 }
  0x1f   : > { %p2676_p0 = pneg %p2658_p11 }
  0x21   : > { %s2228_s16 = scalar_lea.hbm %s3226_s3, 4096 }
  0x22   : > { %p2229_p13 = scmp.ne.s32.totalorder %s3226_s3, %s2228_s16  ;;  %p2235_p4 = scmp.lt.u32.totalorder %s2228_s16, %s3226_s3 }
  0x24   : > { %p2231_p1 = pnand %p2676_p0, %p2229_p13 }
  0x26   : > { %p2232_p2 = pneg %p2231_p1 }
  0x28   : > { %p2237_p5 = pnand %p2235_p4, %p2232_p2 }
  0x2a   : > { %2240 = shalt.err (!%p2237_p5)
}
  0x2b   : > { %s2241_s14 = scalar_lea.vmem %s2651_s28, 4096  ;;  %p2249_p3 = scmp.lt.s32.totalorder %s2651_s28, %s2651_s28 }
  0x2c   : > { %p2242_p7 = scmp.ne.s32.totalorder %s2651_s28, %s2241_s14  ;;  %p2250_p6 = scmp.lt.s32.totalorder %s2241_s14, %s2241_s14 }
  0x2e   : > { %p2244_p9 = pnand %p2242_p7, %p2676_p0  ;;  %p2251_p13 = por %p2250_p6, %p2249_p3 }
  0x30   : > { %p2245_p10 = pneg %p2244_p9 }
  0x32   : > { %p2252_p1 = pnand %p2251_p13, %p2245_p10 }
  0x34   : > { %2255 = shalt.err (!%p2252_p1)
}
  0x35   : > { %s2524_s15 = smov 128   ;;  %s2525_s11 = smov 8  }
  0x36   : > { %2053 = dma.hbm_to_vmem [thread:$0]  (!%p2658_p11), %s3226_s3, 4096, %s2651_s28, [#allocation8], %s2524_s15, %s2524_s15, %s2525_s11  }
  0x37   : > { %s3228_s5 = sld [smem:[#allocation25_spill]] }
  0x3d   : > { %s2256_s9 = scalar_lea.hbm %s3228_s5, 4096 }
  0x3e   : > { %p2257_p3 = scmp.ne.s32.totalorder %s3228_s5, %s2256_s9  ;;  %p2263_p4 = scmp.lt.u32.totalorder %s2256_s9, %s3228_s5 }
  0x40   : > { %p2259_p6 = pnand %p2257_p3, %p2676_p0 }
  0x42   : > { %p2260_p2 = pneg %p2259_p6 }
  0x44   : > { %p2265_p5 = pnand %p2263_p4, %p2260_p2 }
  0x46   : > { %2268 = shalt.err (!%p2265_p5)
}
  0x47   : > { %s2269_s28 = scalar_lea.vmem %s2666_s13, 4096  ;;  %p2277_p13 = scmp.lt.s32.totalorder %s2666_s13, %s2666_s13 }
  0x48   : > { %p2270_p7 = scmp.ne.s32.totalorder %s2666_s13, %s2269_s28  ;;  %p2278_p1 = scmp.lt.s32.totalorder %s2269_s28, %s2269_s28 }
  0x4a   : > { %p2272_p9 = pnand %p2270_p7, %p2676_p0  ;;  %p2279_p3 = por %p2278_p1, %p2277_p13 }
  0x4c   : > { %p2273_p10 = pneg %p2272_p9 }
  0x4e   : > { %p2280_p6 = pnand %p2279_p3, %p2273_p10 }
  0x50   : > { %2283 = shalt.err (!%p2280_p6)
}
  0x51   : > { %2056 = dma.hbm_to_vmem [thread:$0]  (!%p2658_p11), %s3228_s5, 4096, %s2666_s13, [#allocation11], %s2524_s15, %s2524_s15, %s2525_s11  }
  0x52   : > { %s2526_s9 = smov [#allocation12]   ;;  %s2284_s27 = scalar_lea.hbm %s3202_s7, 4096 }
  0x53   : > { %s374_s10 = sshll.u32 %s2526_s9, 4  ;;  %p2285_p2 = scmp.ne.s32.totalorder %s3202_s7, %s2284_s27  ;;  %s375_s10 = int_to_ptr.vmem [resolvable:$true] %s374_s10 }
  0x54   : > { %p2291_p7 = scmp.lt.u32.totalorder %s2284_s27, %s3202_s7 }
  0x55   : > { %p2287_p4 = pnand %p2285_p2, %p2676_p0 }
  0x57   : > { %p2288_p5 = pneg %p2287_p4 }
  0x59   : > { %p2293_p9 = pnand %p2291_p7, %p2288_p5 }
  0x5b   : > { %2296 = shalt.err (!%p2293_p9)
}
  0x5c   : > { %s2297_s13 = scalar_lea.vmem %s375_s10, 4096  ;;  %p2305_p3 = scmp.lt.s32.totalorder %s375_s10, %s375_s10 }
  0x5d   : > { %p2298_p10 = scmp.ne.s32.totalorder %s375_s10, %s2297_s13  ;;  %p2306_p6 = scmp.lt.s32.totalorder %s2297_s13, %s2297_s13 }
  0x5f   : > { %p2300_p13 = pnand %p2298_p10, %p2676_p0  ;;  %p2307_p8 = por %p2306_p6, %p2305_p3 }
  0x61   : > { %p2301_p1 = pneg %p2300_p13 }
  0x63   : > { %p2308_p12 = pnand %p2307_p8, %p2301_p1 }
  0x65   : > { %2311 = shalt.err (!%p2308_p12)
}
  0x66   : > { %s2527_s15 = smov 256   ;;  %s2528_s3 = smov 16  }
  0x67   : > { %2059 = dma.hbm_to_vmem [thread:$0]  (!%p2658_p11), %s3202_s7, 4096, %s375_s10, [#allocation11], %s2527_s15, %s2527_s15, %s2528_s3  }
  0x68   : > { %s2742_s6 = sand.u32 1, %s2508_s19   ;;  %s40_s8 = sadd.s32 1, %s2516_s21 }
  0x69   : > { %s1674_s9 = sshll.u32 %s2742_s6, 7  ;;  %p41_p8 = scmp.ge.s32.totalorder %s40_s8, 2 }
  0x6a   : > { %s1699_s16 = sshll.u32 %s2516_s21, 8  ;;  %s395_s17 = scalar_lea.vmem [#allocation4], %s1674_s9 }
  0x6b   : > { %s405_s27 = sshll.u32 %s395_s17, 4  ;;  %s3251_s8 = smov (%p41_p8, %s40_s8), 0  ;;  %s2754_s27 = int_to_ptr.vmem [resolvable:$true] %s405_s27 }
  0x6c   : > { %s3229_s0 = sld [smem:[#allocation23_spill]]  ;;  %s48_s10 = ssub.s32 %s2516_s21, %s3251_s8 }
  0x6d   : > { %p2758_p11 = scmp.eq.s32.totalorder %s48_s10, 0  ;;  %s392_s24 = scalar_lea.sflag [#allocation5], %s2742_s6 }
  0x6e   : > { %p3231_p0 = scmp.ne.s32.totalorder %s3225_s30, 0 }
  0x70   : > { %p2314_p2 = pneg %p3231_p0 }
  0x72   : > { %s2752_s14 = scalar_lea.hbm %s3229_s0, %s1699_s16  ;;  %s2317_s17 = scalar_lea.hbm %s3229_s0, 4096 }
  0x73   : > { %s2312_s11 = scalar_lea.hbm %s2752_s14, 2048  ;;  %p2318_p7 = scmp.lt.u32.totalorder %s2752_s14, %s3229_s0 }
  0x74   : > { %p2313_p12 = scmp.ne.s32.totalorder %s2752_s14, %s2312_s11  ;;  %p2319_p9 = scmp.lt.u32.totalorder %s2317_s17, %s2312_s11 }
  0x75   : > { %p2321_p13 = scmp.lt.u32.totalorder %s2312_s11, %s2752_s14 }
  0x76   : > { %p2315_p4 = pnand %p2314_p2, %p2313_p12  ;;  %p2320_p10 = por %p2319_p9, %p2318_p7 }
  0x78   : > { %p2316_p5 = pneg %p2315_p4  ;;  %p2322_p1 = por %p2321_p13, %p2320_p10 }
  0x7a   : > { %p2323_p3 = pnand %p2322_p1, %p2316_p5 }
  0x7c   : > { %2326 = shalt.err (!%p2323_p3)
}
  0x7d   : > { %s2327_s10 = scalar_lea.vmem %s2754_s27, 2048  ;;  %s2529_s9 = smov [#allocation4]  }
  0x7e   : > { %p2328_p6 = scmp.ne.s32.totalorder %s2754_s27, %s2327_s10  ;;  %s2332_s16 = sshll.u32 %s2529_s9, 4  ;;  %s2333_s16 = int_to_ptr.vmem [resolvable:$false] %s2332_s16 }
  0x7f   : > { %s2334_s29 = scalar_lea.vmem %s2333_s16, 4096  ;;  %p2335_p4 = scmp.lt.s32.totalorder %s2754_s27, %s2333_s16 }
  0x80   : > { %p2330_p8 = pnand %p2328_p6, %p2314_p2  ;;  %p2336_p7 = scmp.lt.s32.totalorder %s2334_s29, %s2327_s10 }
  0x82   : > { %p2331_p12 = pneg %p2330_p8  ;;  %p2337_p9 = por %p2336_p7, %p2335_p4 }
  0x84   : > { %p2338_p10 = pnand %p2337_p9, %p2331_p12 }
  0x86   : > { %2341 = shalt.err (!%p2338_p10)
}
  0x87   : > { %s2530_s11 = smov 512   ;;  %s3232_s17 = sadd.s32 1, %s2508_s19 }
  0x88   : > { %2063 = dma.hbm_to_vmem [thread:$0]  (!%p3231_p0), %s2752_s14, 2048, %s2754_s27, %s392_s24, %s2530_s11, %s2527_s15, %s2528_s3  }
  0x89   : > { %s2798_s12 = scalar_select %p2758_p11, %s2508_s19, %s3232_s17  }
  0x8a   : > { %s1677_s10 = sshll.u32 %s2742_s6, 9  ;;  %s1701_s9 = sshll.u32 %s2516_s21, 13 }
  0x8b   : > { %s2805_s13 = scalar_lea.hbm %s3196_s1, %s1701_s9  ;;  %s419_s0 = scalar_lea.vmem [#allocation7], %s1677_s10 }
  0x8c   : > { %s427_s5 = sshll.u32 %s419_s0, 4  ;;  %s3233_s27 = sand.u32 1, %s2520_s22   ;;  %s2807_s5 = int_to_ptr.vmem [resolvable:$true] %s427_s5 }
  0x8d   : > { %s2811_s14 = scalar_lea.sflag [#allocation8], %s3233_s27  ;;  %s2342_s28 = scalar_lea.hbm %s2805_s13, 8192 }
  0x8e   : > { %p2343_p11 = scmp.ne.s32.totalorder %s2805_s13, %s2342_s28  ;;  %s2347_s11 = scalar_lea.hbm %s3196_s1, 16384 }
  0x8f   : > { %p2348_p1 = scmp.lt.u32.totalorder %s2805_s13, %s3196_s1  ;;  %p2349_p3 = scmp.lt.u32.totalorder %s2347_s11, %s2342_s28 }
  0x90   : > { %p2345_p5 = pnand %p2343_p11, %p2314_p2  ;;  %p2351_p8 = scmp.lt.u32.totalorder %s2342_s28, %s2805_s13 }
  0x91   : > { %p2350_p6 = por %p2349_p3, %p2348_p1 }
  0x92   : > { %p2346_p13 = pneg %p2345_p5 }
  0x93   : > { %p2352_p12 = por %p2351_p8, %p2350_p6 }
  0x95   : > { %p2353_p4 = pnand %p2352_p12, %p2346_p13 }
  0x97   : > { %2356 = shalt.err (!%p2353_p4)
}
  0x98   : > { %s2357_s0 = scalar_lea.vmem %s2807_s5, 8192  ;;  %s2531_s10 = smov [#allocation7]  }
  0x99   : > { %p2358_p7 = scmp.ne.s32.totalorder %s2807_s5, %s2357_s0  ;;  %s2362_s16 = sshll.u32 %s2531_s10, 4  ;;  %s2363_s16 = int_to_ptr.vmem [resolvable:$false] %s2362_s16 }
  0x9a   : > { %s2364_s29 = scalar_lea.vmem %s2363_s16, 16384  ;;  %p2365_p11 = scmp.lt.s32.totalorder %s2807_s5, %s2363_s16 }
  0x9b   : > { %p2360_p9 = pnand %p2358_p7, %p2314_p2  ;;  %p2366_p5 = scmp.lt.s32.totalorder %s2364_s29, %s2357_s0 }
  0x9d   : > { %p2361_p10 = pneg %p2360_p9  ;;  %p2367_p1 = por %p2366_p5, %p2365_p11 }
  0x9f   : > { %p2368_p3 = pnand %p2367_p1, %p2361_p10 }
  0xa1   : > { %2371 = shalt.err (!%p2368_p3)
}
  0xa2   : > { %2066 = dma.hbm_to_vmem [thread:$0]  (!%p3231_p0), %s2805_s13, 8192, %s2807_s5, %s2811_s14, %s2527_s15, %s2527_s15, %s2528_s3  }
  0xa3   : > { %p3234_p2 = scmp.ne.s32.totalorder %s3223_s26, 0 }
  0xa4   : > { %s441_s27 = sand.u32 (!%p3234_p2), 1, %s2504_s18   ;;  %p3235_p13 = scmp.ne.s32.totalorder (!%p3234_p2), %s3222_s25, 0 }
  0xa5   : > { %439 = sbr.rel (%p3234_p2) target bundleno = 1198 (0x4ae), region = 56  ;;  %s1682_s28 = sshll.u32 (!%p3234_p2), %s441_s27, 7 }
  0xa6   : > { %s442_s6 = scalar_lea.sflag (!%p3234_p2), [#allocation5], %s441_s27  ;;  %s2843_s24 = scalar_lea.vmem (!%p3234_p2), [#allocation4], %s1682_s28 }
  0xac   : > { %2475 = dma.done.wait (%p3235_p13), %s442_s6, 2048  }
  0xad   : > { %2477 = vsyncadd (%p3235_p13), %s442_s6, 4294965248  ;;  %s450_s30 = sand.u32 1, %s2631_s23   ;;  %s1683_s11 = sshll.u32 %s441_s27, 9 }
  0xae   : > { %s451_s5 = scalar_lea.sflag [#allocation8], %s450_s30  ;;  %s2850_s15 = scalar_lea.vmem [#allocation7], %s1683_s11 }
  0xaf   : > { %2479 = dma.done.wait (%p3235_p13), %s451_s5, 8192  }
  0xb0   : > { %2481 = vsyncadd (%p3235_p13), %s451_s5, 4294959104  ;;  %p3236_p0 = scmp.eq.s32.totalorder %s2631_s23, 0 }
  0xb2   : > { %2483 = dma.done.wait (%p3236_p0), [#allocation8], 4096   ;;  %p3237_p6 = pmov %p3236_p0 }
  0xb3   : > { %p3238_p8 = pmov %p3236_p0 }
  0xb4   : > { %2485 = vsyncadd (%p3237_p6), [#allocation8], 4294963200 }
  0xb5   : > { %2487 = dma.done.wait (%p3238_p8), [#allocation11], 8192   ;;  %p3239_p12 = pmov %p3236_p0 }
  0xb6   : > { %p1687_p4 = scmp.ne.s32.totalorder %s2512_s20, 0 }
  0xb7   : > { %2489 = vsyncadd (%p3239_p12), [#allocation11], 4294959104  ;;  %vm531_vm0 = vcmask (!%p1687_p4), 7168   ;;  %v2532_v0 = vmov (!%p1687_p4), 0.0  }
  0xb8   : > { %514 = sbr.rel (%p1687_p4) target bundleno = 196 (0xc4), region = 80  ;;  %515 = vst [vmem:[#allocation2] sm:$0xff] (!%p1687_p4), %v2532_v0  ;;  %516 = vst [vmem:[#allocation2 + $0x8] sm:$0xff] (!%p1687_p4), %v2532_v0 }
  0xb9   : > { %517 = vst [vmem:[#allocation2 + $0x10] sm:$0xff] (!%p1687_p4), %v2532_v0  ;;  %518 = vst [vmem:[#allocation2 + $0x18] sm:$0xff] (!%p1687_p4), %v2532_v0 }
  0xba   : > { %519 = vst [vmem:[#allocation2 + $0x20] sm:$0xff] (!%p1687_p4), %v2532_v0  ;;  %520 = vst [vmem:[#allocation2 + $0x28] sm:$0xff] (!%p1687_p4), %v2532_v0 }
  0xbb   : > { %521 = vst [vmem:[#allocation2 + $0x30] sm:$0xff] (!%p1687_p4), %v2532_v0  ;;  %522 = vst [vmem:[#allocation2 + $0x38] sm:$0xff] (!%p1687_p4), %v2532_v0 }
  0xbc   : > { %523 = vst [vmem:[#allocation2 + $0x40] sm:$0xff] (!%p1687_p4), %v2532_v0  ;;  %524 = vst [vmem:[#allocation2 + $0x48] sm:$0xff] (!%p1687_p4), %v2532_v0 }
  0xbd   : > { %525 = vst [vmem:[#allocation2 + $0x50] sm:$0xff] (!%p1687_p4), %v2532_v0  ;;  %526 = vst [vmem:[#allocation2 + $0x58] sm:$0xff] (!%p1687_p4), %v2532_v0 }
  0xbe   : > { %527 = vst [vmem:[#allocation2 + $0x60] sm:$0xff] (!%p1687_p4), %v2532_v0  ;;  %528 = vst [vmem:[#allocation2 + $0x68] sm:$0xff] (!%p1687_p4), %v2532_v0 }
  0xbf   : > { %529 = vst [vmem:[#allocation2 + $0x70] sm:$0xff] %v2532_v0  ;;  %530 = vst [vmem:[#allocation2 + $0x78] sm:$0xff] %v2532_v0 }
  0xc0   : > { %532 = vst.msk [vmem:[#allocation3] sm:$0xff] %vm531_vm0, %v2532_v0  ;;  %533 = vst.msk [vmem:[#allocation3 + $0x8] sm:$0xff] %vm531_vm0, %v2532_v0 }
  0xc1   : > { %534 = vst.msk [vmem:[#allocation3 + $0x10] sm:$0xff] %vm531_vm0, %v2532_v0  ;;  %535 = vst.msk [vmem:[#allocation3 + $0x18] sm:$0xff] %vm531_vm0, %v2532_v0 }
  0xc2   : > { %536 = vst.msk [vmem:[#allocation3 + $0x20] sm:$0xff] %vm531_vm0, %v2532_v0  ;;  %537 = vst.msk [vmem:[#allocation3 + $0x28] sm:$0xff] %vm531_vm0, %v2532_v0 }
  0xc3   : > { %538 = vst.msk [vmem:[#allocation3 + $0x30] sm:$0xff] %vm531_vm0, %v2532_v0  ;;  %539 = vst.msk [vmem:[#allocation3 + $0x38] sm:$0xff] %vm531_vm0, %v2532_v0 }
  0xc4 PF: > { %v622_v1 = vld [vmem:[%s2850_s15 + $0x8] sm:$0xff]  ;;  %v624_v2 = vld [vmem:[%s2850_s15 + $0x18] sm:$0xff]  ;;  %v621_v3 = vld [vmem:[%s2850_s15] sm:$0xff]  ;;  %vm612_vm1 = vcmask 7168   ;;  %p1688_p7 = scmp.ne.s32.totalorder %s2512_s20, 1 }
  0xc5   : > { %v1814_v4 = vpack.c.bf16 %v624_v2, %v622_v1  ;;  %v623_v5 = vld [vmem:[%s2850_s15 + $0x10] sm:$0xff]  ;;  %v626_v6 = vld [vmem:[%s2850_s15 + $0x28] sm:$0xff]  ;;  %v628_v7 = vld [vmem:[%s2850_s15 + $0x38] sm:$0xff]  ;;  %s3240_s17 = sld [smem:[#allocation26_spill]] (!%p1688_p7)  ;;  %s3241_s10 = sld [smem:[#allocation27_spill]] (!%p1688_p7) }
  0xc6   : > { %v1816_v8 = vpack.c.bf16 %v623_v5, %v621_v3  ;;  %v1818_v9 = vpack.c.bf16 %v628_v7, %v626_v6  ;;  %v625_v10 = vld [vmem:[%s2850_s15 + $0x20] sm:$0xff]  ;;  %v627_v11 = vld [vmem:[%s2850_s15 + $0x30] sm:$0xff]  ;;  %v630_v12 = vld [vmem:[%s2850_s15 + $0x48] sm:$0xff] }
  0xc7   : > { %1815 = vmatprep.subr.bf16.mxu0 %v1814_v4  ;;  %1974 = vmatprep.subr.bf16.mxu1 %v1814_v4  ;;  %v632_v13 = vld [vmem:[%s2850_s15 + $0x58] sm:$0xff]  ;;  %v1820_v14 = vpack.c.bf16 %v627_v11, %v625_v10  ;;  %v629_v16 = vld [vmem:[%s2850_s15 + $0x40] sm:$0xff]  ;;  %v631_v17 = vld [vmem:[%s2850_s15 + $0x50] sm:$0xff] }
  0xc8   : > { %1817 = vmatpush1.bf16.msra.mxu0 %v1816_v8  ;;  %1990 = vmatpush1.bf16.msra.mxu1 %v1816_v8  ;;  %v1822_v15 = vpack.c.bf16 %v632_v13, %v630_v12  ;;  %v634_v18 = vld [vmem:[%s2850_s15 + $0x68] sm:$0xff]  ;;  %v636_v19 = vld [vmem:[%s2850_s15 + $0x78] sm:$0xff]  ;;  %v1824_v20 = vpack.c.bf16 %v631_v17, %v629_v16  ;;  %v633_v22 = vld [vmem:[%s2850_s15 + $0x60] sm:$0xff] }
  0xc9   : > { %1819 = vmatprep.subr.bf16.mxu0 %v1818_v9  ;;  %1975 = vmatprep.subr.bf16.mxu1 %v1818_v9  ;;  %v1826_v21 = vpack.c.bf16 %v636_v19, %v634_v18  ;;  %v635_v23 = vld [vmem:[%s2850_s15 + $0x70] sm:$0xff]  ;;  %v638_v24 = vld [vmem:[%s2850_s15 + $0x88] sm:$0xff]  ;;  %v640_v25 = vld [vmem:[%s2850_s15 + $0x98] sm:$0xff] }
  0xca   : > { %v1828_v26 = vpack.c.bf16 %v635_v23, %v633_v22  ;;  %v1830_v27 = vpack.c.bf16 %v640_v25, %v638_v24  ;;  %v637_v28 = vld [vmem:[%s2850_s15 + $0x80] sm:$0xff]  ;;  %v639_v29 = vld [vmem:[%s2850_s15 + $0x90] sm:$0xff]  ;;  %v642_v30 = vld [vmem:[%s2850_s15 + $0xa8] sm:$0xff] }
  0xcb   : > { %v644_v31 = vld [vmem:[%s2850_s15 + $0xb8] sm:$0xff]  ;;  %v1832_v32 = vpack.c.bf16 %v639_v29, %v637_v28  ;;  %v641_v34 = vld [vmem:[%s2850_s15 + $0xa0] sm:$0xff]  ;;  %v643_v35 = vld [vmem:[%s2850_s15 + $0xb0] sm:$0xff] }
  0xcc   : > { %1821 = vmatpush1.bf16.msra.mxu0 %v1820_v14  ;;  %1991 = vmatpush1.bf16.msra.mxu1 %v1820_v14  ;;  %v1834_v33 = vpack.c.bf16 %v644_v31, %v642_v30  ;;  %v646_v36 = vld [vmem:[%s2850_s15 + $0xc8] sm:$0xff]  ;;  %v648_v37 = vld [vmem:[%s2850_s15 + $0xd8] sm:$0xff]  ;;  %v1836_v38 = vpack.c.bf16 %v643_v35, %v641_v34  ;;  %v645_v39 = vld [vmem:[%s2850_s15 + $0xc0] sm:$0xff] }
  0xcd   : > { %1823 = vmatprep.subr.bf16.mxu0 %v1822_v15  ;;  %1976 = vmatprep.subr.bf16.mxu1 %v1822_v15  ;;  %v1838_v40 = vpack.c.bf16 %v648_v37, %v646_v36  ;;  %v647_v41 = vld [vmem:[%s2850_s15 + $0xd0] sm:$0xff]  ;;  %v541_v42 = vld [vmem:[%s2843_s24 + $0x8] sm:$0xff]  ;;  %v652_v45 = vld [vmem:[%s2850_s15 + $0xf8] sm:$0xff] }
  0xce   : > { %v549_v43 = vld [vmem:[%s2843_s24 + $0x48] sm:$0xff]  ;;  %v565_v46 = vmul.f32 %v541_v42, %v541_v42  ;;  %765 = vmatprep.mubr.f32.mxu0 %v541_v42  ;;  %v2906_v47 = vld [vmem:[%s2843_s24] sm:$0xff]  ;;  %v651_v49 = vld [vmem:[%s2850_s15 + $0xf0] sm:$0xff]  ;;  %v1840_v52 = vpack.c.bf16 %v647_v41, %v645_v39 }
  0xcf   : > { %v650_v44 = vld [vmem:[%s2850_s15 + $0xe8] sm:$0xff]  ;;  %789 = vmatprep.mubr.f32.mxu1 %v549_v43  ;;  %v649_v48 = vld [vmem:[%s2850_s15 + $0xe0] sm:$0xff]  ;;  %v564_v51 = vmul.f32 %v2906_v47, %v2906_v47  ;;  %v656_v53 = vld [vmem:[%s2850_s15 + $0x118] sm:$0xff]  ;;  %v573_v13 = vmul.f32 %v549_v43, %v549_v43 }
  0xd0   : > { %1825 = vmatpush1.bf16.msra.mxu0 %v1824_v20  ;;  %1992 = vmatpush1.bf16.msra.mxu1 %v1824_v20  ;;  %v654_v50 = vld [vmem:[%s2850_s15 + $0x108] sm:$0xff]  ;;  %v2918_v55 = vld [vmem:[%s2843_s24 + $0x20] sm:$0xff]  ;;  %v1842_v56 = vpack.c.bf16 %v652_v45, %v650_v44  ;;  %v2921_v57 = vld [vmem:[%s2843_s24 + $0x18] sm:$0xff]  ;;  %v1844_v6 = vpack.c.bf16 %v651_v49, %v649_v48 }
  0xd1   : > { %1827 = vmatprep.subr.bf16.mxu0 %v1826_v21  ;;  %1977 = vmatprep.subr.bf16.mxu1 %v1826_v21  ;;  %v2915_v54 = vld [vmem:[%s2843_s24 + $0x28] sm:$0xff]  ;;  %v2924_v58 = vld [vmem:[%s2843_s24 + $0x10] sm:$0xff]  ;;  %v2927_v59 = vld [vmem:[%s2843_s24 + $0x38] sm:$0xff]  ;;  %v568_v60 = vmul.f32 %v2918_v55, %v2918_v55  ;;  %v567_v62 = vmul.f32 %v2921_v57, %v2921_v57  ;;  %v580_v2 = vadd.f32 %v565_v46, %v564_v51 }
  0xd2   : > { %v569_v61 = vmul.f32 %v2915_v54, %v2915_v54  ;;  %v566_v63 = vmul.f32 %v2924_v58, %v2924_v58  ;;  %v571_v0 = vmul.f32 %v2927_v59, %v2927_v59  ;;  %v2940_v1 = vld [vmem:[%s2843_s24 + $0x30] sm:$0xff]  ;;  %v653_v3 = vld [vmem:[%s2850_s15 + $0x100] sm:$0xff]  ;;  %v1846_v7 = vpack.c.bf16 %v656_v53, %v654_v50  ;;  %v2950_v10 = vld [vmem:[%s2843_s24 + $0x58] sm:$0xff] }
  0xd3   : > { %v570_v4 = vmul.f32 %v2940_v1, %v2940_v1  ;;  %v655_v8 = vld [vmem:[%s2850_s15 + $0x110] sm:$0xff]  ;;  %v2947_v9 = vld [vmem:[%s2843_s24 + $0x40] sm:$0xff]  ;;  %v658_v11 = vld [vmem:[%s2850_s15 + $0x128] sm:$0xff]  ;;  %v575_v15 = vmul.f32 %v2950_v10, %v2950_v10  ;;  %581 = vadd.xlane.f32.xlu0 %v580_v2 }
  0xd4   : > { %1829 = vmatpush1.bf16.msra.mxu0 %v1828_v26  ;;  %1993 = vmatpush1.bf16.msra.mxu1 %v1828_v26  ;;  %v586_v5 = vadd.f32 %v569_v61, %v568_v60  ;;  %v660_v12 = vld [vmem:[%s2850_s15 + $0x138] sm:$0xff]  ;;  %v572_v14 = vmul.f32 %v2947_v9, %v2947_v9  ;;  %v2959_v16 = vld [vmem:[%s2843_s24 + $0x50] sm:$0xff]  ;;  %v583_v19 = vadd.f32 %v567_v62, %v566_v63  ;;  %v2964_v22 = vld [vmem:[%s2843_s24 + $0x68] sm:$0xff] }
  0xd5   : > { %1831 = vmatprep.subr.bf16.mxu0 %v1830_v27  ;;  %1978 = vmatprep.subr.bf16.mxu1 %v1830_v27  ;;  %v574_v17 = vmul.f32 %v2959_v16, %v2959_v16  ;;  %v589_v18 = vadd.f32 %v571_v0, %v570_v4  ;;  %v1848_v20 = vpack.c.bf16 %v655_v8, %v653_v3  ;;  %v2967_v23 = vld [vmem:[%s2843_s24 + $0x60] sm:$0xff]  ;;  %v2970_v24 = vld [vmem:[%s2843_s24 + $0x78] sm:$0xff]  ;;  %v659_v26 = vld [vmem:[%s2850_s15 + $0x130] sm:$0xff] }
  0xd6   : > { %587 = vadd.xlane.f32.xlu1 %v586_v5  ;;  %v1850_v21 = vpack.c.bf16 %v660_v12, %v658_v11  ;;  %v657_v25 = vld [vmem:[%s2850_s15 + $0x120] sm:$0xff]  ;;  %v577_v27 = vmul.f32 %v2964_v22, %v2964_v22  ;;  %v576_v28 = vmul.f32 %v2967_v23, %v2967_v23  ;;  %v579_v29 = vmul.f32 %v2970_v24, %v2970_v24  ;;  %v2981_v30 = vld [vmem:[%s2843_s24 + $0x70] sm:$0xff]  ;;  %v662_v31 = vld [vmem:[%s2850_s15 + $0x148] sm:$0xff] }
  0xd7   : > { %584 = vadd.xlane.f32.xlu0 %v583_v19  ;;  %v595_v34 = vadd.f32 %v575_v15, %v574_v17  ;;  %v592_v35 = vadd.f32 %v573_v13, %v572_v14  ;;  %v1852_v36 = vpack.c.bf16 %v659_v26, %v657_v25  ;;  %v663_v39 = vld [vmem:[%s2850_s15 + $0x150] sm:$0xff]  ;;  %v668_v41 = vld [vmem:[%s2850_s15 + $0x178] sm:$0xff]  ;;  %v665_v46 = vld [vmem:[%s2850_s15 + $0x160] sm:$0xff] }
  0xd8   : > { %1833 = vmatpush1.bf16.msra.mxu0 %v1832_v32  ;;  %1994 = vmatpush1.bf16.msra.mxu1 %v1832_v32  ;;  %v664_v32 = vld [vmem:[%s2850_s15 + $0x158] sm:$0xff]  ;;  %v598_v43 = vadd.f32 %v577_v27, %v576_v28  ;;  %v667_v48 = vld [vmem:[%s2850_s15 + $0x170] sm:$0xff]  ;;  %v670_v49 = vld [vmem:[%s2850_s15 + $0x188] sm:$0xff] }
  0xd9   : > { %1835 = vmatprep.subr.bf16.mxu0 %v1834_v33  ;;  %1979 = vmatprep.subr.bf16.mxu1 %v1834_v33  ;;  %v578_v33 = vmul.f32 %v2981_v30, %v2981_v30  ;;  %v1854_v37 = vpack.c.bf16 %v664_v32, %v662_v31  ;;  %v672_v50 = vld [vmem:[%s2850_s15 + $0x198] sm:$0xff]  ;;  %v1860_v51 = vpack.c.bf16 %v667_v48, %v665_v46  ;;  %v669_v53 = vld [vmem:[%s2850_s15 + $0x180] sm:$0xff]  ;;  %v674_v60 = vld [vmem:[%s2850_s15 + $0x1a8] sm:$0xff] }
  0xda   : > { %590 = vadd.xlane.f32.xlu1 %v589_v18  ;;  %v676_v61 = vld [vmem:[%s2850_s15 + $0x1b8] sm:$0xff]  ;;  %v673_v0 = vld [vmem:[%s2850_s15 + $0x1a0] sm:$0xff]  ;;  %v675_v2 = vld [vmem:[%s2850_s15 + $0x1b0] sm:$0xff] }
  0xdb   : > { %593 = vadd.xlane.f32.xlu0 %v592_v35  ;;  %v601_v42 = vadd.f32 %v579_v29, %v578_v33  ;;  %v1866_v63 = vpack.c.bf16 %v676_v61, %v674_v60  ;;  %v678_v3 = vld [vmem:[%s2850_s15 + $0x1c8] sm:$0xff]  ;;  %v680_v4 = vld [vmem:[%s2850_s15 + $0x1d8] sm:$0xff]  ;;  %v1868_v5 = vpack.c.bf16 %v675_v2, %v673_v0  ;;  %v679_v8 = vld [vmem:[%s2850_s15 + $0x1d0] sm:$0xff] }
  0xdc   : > { %1837 = vmatpush1.bf16.msra.mxu0 %v1836_v38  ;;  %1995 = vmatpush1.bf16.msra.mxu1 %v1836_v38  ;;  %v661_v38 = vld [vmem:[%s2850_s15 + $0x140] sm:$0xff]  ;;  %v682_v11 = vld [vmem:[%s2850_s15 + $0x1e8] sm:$0xff]  ;;  %v684_v12 = vld [vmem:[%s2850_s15 + $0x1f8] sm:$0xff] }
  0xdd   : > { %1839 = vmatprep.subr.bf16.mxu0 %v1838_v40  ;;  %1980 = vmatprep.subr.bf16.mxu1 %v1838_v40  ;;  %v666_v40 = vld [vmem:[%s2850_s15 + $0x168] sm:$0xff]  ;;  %v1856_v44 = vpack.c.bf16 %v663_v39, %v661_v38  ;;  %v1874_v14 = vpack.c.bf16 %v684_v12, %v682_v11  ;;  %v681_v15 = vld [vmem:[%s2850_s15 + $0x1e0] sm:$0xff]  ;;  %v683_v17 = vld [vmem:[%s2850_s15 + $0x1f0] sm:$0xff] }
  0xde   : > { %596 = vadd.xlane.f32.xlu1 %v595_v34  ;;  %v1858_v45 = vpack.c.bf16 %v668_v41, %v666_v40  ;;  %v1876_v18 = vpack.c.bf16 %v683_v17, %v681_v15  ;;  %v557_v19 = vld [vmem:[#allocation3 + $0x8] sm:$0xff]  ;;  %v563_v27 = vld [vmem:[#allocation3 + $0x38] sm:$0xff]  ;;  %v562_v28 = vld [vmem:[#allocation3 + $0x30] sm:$0xff] }
  0xdf   : > { %599 = vadd.xlane.f32.xlu0 %v598_v43  ;;  %v685_v33 = vld [vmem:[#allocation2] sm:$0xff]  ;;  %v694_v35 = vld [vmem:[#allocation2 + $0x48] sm:$0xff]  ;;  %v695_v46 = vld [vmem:[#allocation2 + $0x50] sm:$0xff] }
  0xe0   : > { %1841 = vmatpush1.bf16.msra.mxu0 %v1840_v52  ;;  %1996 = vmatpush1.bf16.msra.mxu1 %v1840_v52  ;;  %v1862_v52 = vpack.c.bf16 %v672_v50, %v670_v49  ;;  %v693_v34 = vld [vmem:[#allocation2 + $0x40] sm:$0xff]  ;;  %v696_v48 = vld [vmem:[#allocation2 + $0x58] sm:$0xff]  ;;  %v698_v2 = vld [vmem:[#allocation2 + $0x68] sm:$0xff] }
  0xe1   : > { %1843 = vmatprep.subr.bf16.mxu0 %v1842_v56  ;;  %1981 = vmatprep.subr.bf16.mxu1 %v1842_v56  ;;  %v671_v56 = vld [vmem:[%s2850_s15 + $0x190] sm:$0xff]  ;;  %v688_v49 = vld [vmem:[#allocation2 + $0x18] sm:$0xff]  ;;  %v697_v0 = vld [vmem:[#allocation2 + $0x60] sm:$0xff] }
  0xe2   : > { %602 = vadd.xlane.f32.xlu1 %v601_v42  ;;  %v1864_v62 = vpack.c.bf16 %v671_v56, %v669_v53  ;;  %v699_v15 = vld [vmem:[#allocation2 + $0x70] sm:$0xff]  ;;  %v700_v17 = vld [vmem:[#allocation2 + $0x78] sm:$0xff] }
  0xe4   : > { %1845 = vmatpush1.bf16.msra.mxu0 %v1844_v6  ;;  %1997 = vmatpush1.bf16.msra.mxu1 %v1844_v6  ;;  %v1870_v6 = vpack.c.bf16 %v680_v4, %v678_v3  ;;  %v690_v3 = vld [vmem:[#allocation2 + $0x28] sm:$0xff] }
  0xe5   : > { %1847 = vmatprep.subr.bf16.mxu0 %v1846_v7  ;;  %1982 = vmatprep.subr.bf16.mxu1 %v1846_v7  ;;  %v677_v7 = vld [vmem:[%s2850_s15 + $0x1c0] sm:$0xff] }
  0xe6   : > { %v1872_v13 = vpack.c.bf16 %v679_v8, %v677_v7 }
  0xe8   : > { %1849 = vmatpush1.bf16.msra.mxu0 %v1848_v20  ;;  %1998 = vmatpush1.bf16.msra.mxu1 %v1848_v20 }
  0xe9   : > { %1851 = vmatprep.subr.bf16.mxu0 %v1850_v21  ;;  %1983 = vmatprep.subr.bf16.mxu1 %v1850_v21 }
  0xec   : > { %1853 = vmatpush1.bf16.msra.mxu0 %v1852_v36  ;;  %1999 = vmatpush1.bf16.msra.mxu1 %v1852_v36  ;;  %v686_v36 = vld [vmem:[#allocation2 + $0x8] sm:$0xff] }
  0xed   : > { %1855 = vmatprep.subr.bf16.mxu0 %v1854_v37  ;;  %1984 = vmatprep.subr.bf16.mxu1 %v1854_v37 }
  0xf0   : > { %1857 = vmatpush1.bf16.msra.mxu0 %v1856_v44  ;;  %2000 = vmatpush1.bf16.msra.mxu1 %v1856_v44 }
  0xf1   : > { %1859 = vmatprep.subr.bf16.mxu0 %v1858_v45  ;;  %1985 = vmatprep.subr.bf16.mxu1 %v1858_v45  ;;  %v687_v45 = vld [vmem:[#allocation2 + $0x10] sm:$0xff] }
  0xf4   : > { %1861 = vmatpush1.bf16.msra.mxu0 %v1860_v51  ;;  %2001 = vmatpush1.bf16.msra.mxu1 %v1860_v51 }
  0xf5   : > { %1863 = vmatprep.subr.bf16.mxu0 %v1862_v52  ;;  %1986 = vmatprep.subr.bf16.mxu1 %v1862_v52 }
  0xf8   : > { %1865 = vmatpush1.bf16.msra.mxu0 %v1864_v62  ;;  %2002 = vmatpush1.bf16.msra.mxu1 %v1864_v62 }
  0xf9   : > { %1867 = vmatprep.subr.bf16.mxu0 %v1866_v63  ;;  %1987 = vmatprep.subr.bf16.mxu1 %v1866_v63  ;;  %v689_v63 = vld [vmem:[#allocation2 + $0x20] sm:$0xff] }
  0xfc   : > { %1869 = vmatpush1.bf16.msra.mxu0 %v1868_v5  ;;  %2003 = vmatpush1.bf16.msra.mxu1 %v1868_v5 }
  0xfd   : > { %1871 = vmatprep.subr.bf16.mxu0 %v1870_v6  ;;  %1988 = vmatprep.subr.bf16.mxu1 %v1870_v6 }
 0x100   : > { %1873 = vmatpush1.bf16.msra.mxu0 %v1872_v13  ;;  %2004 = vmatpush1.bf16.msra.mxu1 %v1872_v13 }
 0x101   : > { %1875 = vmatprep.subr.bf16.mxu0 %v1874_v14  ;;  %1989 = vmatprep.subr.bf16.mxu1 %v1874_v14  ;;  %v691_v14 = vld [vmem:[#allocation2 + $0x30] sm:$0xff] }
 0x104   : > { %1877 = vmatpush1.bf16.msra.mxu0 %v1876_v18  ;;  %2005 = vmatpush1.bf16.msra.mxu1 %v1876_v18  ;;  %v692_v18 = vld [vmem:[#allocation2 + $0x38] sm:$0xff] }
 0x107   : > { %766 = vmatmul.mubr.f32.vlgmr.msra.gmra.mrb[0].mxu0 %v2906_v47  ;;  %790 = vmatmul.mubr.f32.vlgmr.msra.gmra.mrb[0].mxu1 %v2947_v9  ;;  %v558_v47 = vld [vmem:[#allocation3 + $0x10] sm:$0xff] }
 0x108   : > { %771 = vmatprep.mubr.f32.mxu0 %v2921_v57  ;;  %795 = vmatprep.mubr.f32.mxu1 %v2950_v10  ;;  %v556_v57 = vld [vmem:[#allocation3] sm:$0xff] }
 0x10b   : > { %772 = vmatmul.mubr.f32.gmra.mrb[2].mxu0 %v2924_v58  ;;  %796 = vmatmul.mubr.f32.gmra.mrb[2].mxu1 %v2959_v16  ;;  %v559_v16 = vld [vmem:[#allocation3 + $0x18] sm:$0xff] }
 0x10c   : > { %777 = vmatprep.mubr.f32.mxu0 %v2915_v54  ;;  %801 = vmatprep.mubr.f32.mxu1 %v2964_v22  ;;  %v560_v22 = vld [vmem:[#allocation3 + $0x20] sm:$0xff] }
 0x10f   : > { %778 = vmatmul.mubr.f32.gmra.mrb[4].mxu0 %v2918_v55  ;;  %802 = vmatmul.mubr.f32.gmra.mrb[4].mxu1 %v2967_v23 }
 0x110   : > { %783 = vmatprep.mubr.f32.mxu0 %v2927_v59  ;;  %807 = vmatprep.mubr.f32.mxu1 %v2970_v24 }
 0x113   : > { %784 = vmatmul.mubr.f32.gmra.mrb[6].mxu0 %v2940_v1  ;;  %808 = vmatmul.mubr.f32.gmra.mrb[6].mxu1 %v2981_v30  ;;  %v561_v1 = vld [vmem:[#allocation3 + $0x28] sm:$0xff] }
 0x160   : > { %v582_v9 = vpop.xlane.xlu0 %581 }
 0x161   : > { %v604_v10 = vadd.f32 %v582_v9, %v556_v57 }
 0x163   : > { %v588_v58 = vpop.xlane.xlu1 %587  ;;  %613 = vst.msk [vmem:[#allocation3] sm:$0xff] %vm612_vm1, %v604_v10 }
 0x164   : > { %v606_v54 = vadd.f32 %v588_v58, %v558_v47  ;;  %v585_v59 = vpop.xlane.xlu0 %584 }
 0x165   : > { %v605_v21 = vadd.f32 %v585_v59, %v557_v19 }
 0x166   : > { %615 = vst.msk [vmem:[#allocation3 + $0x10] sm:$0xff] %vm612_vm1, %v606_v54 }
 0x167   : > { %v591_v55 = vpop.xlane.xlu1 %590  ;;  %614 = vst.msk [vmem:[#allocation3 + $0x8] sm:$0xff] %vm612_vm1, %v605_v21  ;;  %v2533_v21 = vmov (!%p1688_p7), 0  }
 0x168   : > { %v607_v20 = vadd.f32 %v591_v55, %v559_v16  ;;  %v594_v24 = vpop.xlane.xlu0 %593  ;;  %2147 = vset.pattern.permute.xlu1 (!%p1688_p7), %v2533_v21  ;;  %2146 = vset.pattern.permute.xlu0 (!%p1688_p7), %v2533_v21 }
 0x169   : > { %v608_v26 = vadd.f32 %v594_v24, %v560_v22 }
 0x16a   : > { %616 = vst.msk [vmem:[#allocation3 + $0x18] sm:$0xff] %vm612_vm1, %v607_v20  ;;  %v850_v59 = vld [vmem:[#allocation3] sm:$0xff] (!%p1688_p7) }
 0x16b   : > { %v597_v23 = vpop.xlane.xlu1 %596  ;;  %617 = vst.msk [vmem:[#allocation3 + $0x20] sm:$0xff] %vm612_vm1, %v608_v26  ;;  %v858_v22 = vmax.f32 (!%p1688_p7), %v850_v59, 1e-24 }
 0x16c   : > { %v609_v25 = vadd.f32 %v597_v23, %v561_v1  ;;  %v600_v30 = vpop.xlane.xlu0 %599 }
 0x16d   : > { %v610_v32 = vadd.f32 %v600_v30, %v562_v28  ;;  %v852_v55 = vld [vmem:[#allocation3 + $0x10] sm:$0xff] (!%p1688_p7) }
 0x16e   : > { %618 = vst.msk [vmem:[#allocation3 + $0x28] sm:$0xff] %vm612_vm1, %v609_v25  ;;  %v860_v1 = vmax.f32 (!%p1688_p7), %v852_v55, 1e-24  ;;  %v851_v24 = vld [vmem:[#allocation3 + $0x8] sm:$0xff] (!%p1688_p7)  ;;  %v1030_v55 = vld [vmem:[#allocation10 + $0x38] sm:$0xff] (!%p1688_p7) }
 0x16f   : > { %v603_v29 = vpop.xlane.xlu1 %602  ;;  %619 = vst.msk [vmem:[#allocation3 + $0x30] sm:$0xff] %vm612_vm1, %v610_v32  ;;  %v859_v26 = vmax.f32 (!%p1688_p7), %v851_v24, 1e-24  ;;  %v1007_v32 = vld [vmem:[#allocation9 + $0x88] sm:$0xff] (!%p1688_p7)  ;;  %v1047_v24 = vld [vmem:[#allocation10 + $0xc0] sm:$0xff] (!%p1688_p7) }
 0x170   : > { %v611_v31 = vadd.f32 %v603_v29, %v563_v27  ;;  %2148 = vrsqrt.f32 (!%p1688_p7), %v860_v1  ;;  %v1006_v29 = vld [vmem:[#allocation9 + $0x80] sm:$0xff] (!%p1688_p7) }
 0x171   : > { %v853_v20 = vld [vmem:[#allocation3 + $0x18] sm:$0xff] (!%p1688_p7)  ;;  %2150 = vrsqrt.f32 (!%p1688_p7), %v858_v22  ;;  %v1014_v1 = vld [vmem:[#allocation9 + $0xc0] sm:$0xff] (!%p1688_p7)  ;;  %v1015_v22 = vld [vmem:[#allocation9 + $0xc8] sm:$0xff] (!%p1688_p7) }
 0x172   : > { %620 = vst.msk [vmem:[#allocation3 + $0x38] sm:$0xff] %vm612_vm1, %v611_v31  ;;  %v861_v23 = vmax.f32 (!%p1688_p7), %v853_v20, 1e-24  ;;  %v854_v27 = vld [vmem:[#allocation3 + $0x20] sm:$0xff] (!%p1688_p7) }
 0x174   : > { %2152 = vrsqrt.f32 (!%p1688_p7), %v861_v23 }
 0x175   : > { %v855_v25 = vld [vmem:[#allocation3 + $0x28] sm:$0xff] (!%p1688_p7)  ;;  %2154 = vrsqrt.f32 (!%p1688_p7), %v859_v26  ;;  %v998_v26 = vld [vmem:[#allocation9 + $0x40] sm:$0xff] (!%p1688_p7) }
 0x176   : > { %v863_v30 = vmax.f32 (!%p1688_p7), %v855_v25, 1e-24  ;;  %v856_v31 = vld [vmem:[#allocation3 + $0x30] sm:$0xff] (!%p1688_p7)  ;;  %v1048_v25 = vld [vmem:[#allocation10 + $0xc8] sm:$0xff] (!%p1688_p7) }
 0x178   : > { %2156 = vrsqrt.f32 (!%p1688_p7), %v863_v30  ;;  %v1031_v30 = vld [vmem:[#allocation10 + $0x40] sm:$0xff] (!%p1688_p7) }
 0x179   : > { %v857_v28 = vld [vmem:[#allocation3 + $0x38] sm:$0xff] (!%p1688_p7) }
 0x1da   : > { %v767_v37 = vpop.f32.mrb[0].mxu0  ;;  %v791_v38 = vpop.f32.mrb[0].mxu1 }
 0x1db   : > { %v814_v39 = vadd.f32 %v767_v37, %v685_v33  ;;  %v822_v40 = vadd.f32 %v791_v38, %v693_v34  ;;  %v793_v41 = vpop.f32.mrb[1].mxu1  ;;  %v769_v42 = vpop.f32.mrb[1].mxu0  ;;  %v1039_v33 = vld [vmem:[#allocation10 + $0x80] sm:$0xff] (!%p1688_p7)  ;;  %v862_v34 = vmax.f32 (!%p1688_p7), %v854_v27, 1e-24  ;;  %v991_v38 = vld [vmem:[#allocation9 + $0x8] sm:$0xff] (!%p1688_p7) }
 0x1dc   : > { %v823_v43 = vadd.f32 %v793_v41, %v694_v35  ;;  %v815_v44 = vadd.f32 %v769_v42, %v686_v36  ;;  %v1878_v35 = vpack.c.bf16 (!%p1688_p7), %v1007_v32, %v1006_v29  ;;  %v1040_v36 = vld [vmem:[#allocation10 + $0x88] sm:$0xff] (!%p1688_p7)  ;;  %v990_v37 = vld [vmem:[#allocation9] sm:$0xff] (!%p1688_p7) }
 0x1dd   : > { %830 = vst [vmem:[#allocation2] sm:$0xff] %v814_v39  ;;  %838 = vst [vmem:[#allocation2 + $0x40] sm:$0xff] %v822_v40  ;;  %v1910_v39 = vpack.c.bf16 (!%p1688_p7), %v1040_v36, %v1039_v33  ;;  %v1880_v40 = vpack.c.bf16 (!%p1688_p7), %v991_v38, %v990_v37  ;;  %v1023_v41 = vld [vmem:[#allocation10] sm:$0xff] (!%p1688_p7)  ;;  %v1024_v42 = vld [vmem:[#allocation10 + $0x8] sm:$0xff] (!%p1688_p7)  ;;  %2158 = vrsqrt.f32 (!%p1688_p7), %v862_v34  ;;  %v1926_v33 = vpack.c.bf16 (!%p1688_p7), %v1048_v25, %v1047_v24 }
 0x1de   : > { %839 = vst [vmem:[#allocation2 + $0x48] sm:$0xff] %v823_v43  ;;  %831 = vst [vmem:[#allocation2 + $0x8] sm:$0xff] %v815_v44  ;;  %v773_v50 = vpop.f32.mrb[2].mxu0  ;;  %v797_v51 = vpop.f32.mrb[2].mxu1  ;;  %v1008_v43 = vld [vmem:[#allocation9 + $0x90] sm:$0xff] (!%p1688_p7)  ;;  %1879 = vmatprep.subr.bf16.mxu0 (!%p1688_p7), %v1878_v35  ;;  %v1912_v44 = vpack.c.bf16 (!%p1688_p7), %v1024_v42, %v1023_v41  ;;  %v999_v29 = vld [vmem:[#allocation9 + $0x48] sm:$0xff] (!%p1688_p7) }
 0x1df   : > { %v816_v52 = vadd.f32 %v773_v50, %v687_v45  ;;  %v824_v53 = vadd.f32 %v797_v51, %v695_v46  ;;  %v799_v56 = vpop.f32.mrb[3].mxu1  ;;  %v775_v60 = vpop.f32.mrb[3].mxu0  ;;  %v1009_v45 = vld [vmem:[#allocation9 + $0x98] sm:$0xff] (!%p1688_p7)  ;;  %v1041_v46 = vld [vmem:[#allocation10 + $0x90] sm:$0xff] (!%p1688_p7)  ;;  %1911 = vmatprep.subr.bf16.mxu1 (!%p1688_p7), %v1910_v39  ;;  %1881 = vmatpush3.bf16.msra.mxu0 (!%p1688_p7), %v1880_v40  ;;  %v1896_v35 = vpack.c.bf16 (!%p1688_p7), %v999_v29, %v998_v26 }
 0x1e0   : > { %v825_v61 = vadd.f32 %v799_v56, %v696_v48  ;;  %v817_v62 = vadd.f32 %v775_v60, %v688_v49  ;;  %v1042_v48 = vld [vmem:[#allocation10 + $0x98] sm:$0xff] (!%p1688_p7)  ;;  %v865_v49 = vmax.f32 (!%p1688_p7), %v857_v28, 1e-24  ;;  %v1882_v50 = vpack.c.bf16 (!%p1688_p7), %v1009_v45, %v1008_v43  ;;  %v1025_v56 = vld [vmem:[#allocation10 + $0x10] sm:$0xff] (!%p1688_p7)  ;;  %1913 = vmatpush3.bf16.msra.mxu1 (!%p1688_p7), %v1912_v44 }
 0x1e1   : > { %832 = vst [vmem:[#allocation2 + $0x10] sm:$0xff] %v816_v52  ;;  %840 = vst [vmem:[#allocation2 + $0x50] sm:$0xff] %v824_v53  ;;  %v1914_v51 = vpack.c.bf16 (!%p1688_p7), %v1042_v48, %v1041_v46  ;;  %v992_v52 = vld [vmem:[#allocation9 + $0x10] sm:$0xff] (!%p1688_p7)  ;;  %v993_v53 = vld [vmem:[#allocation9 + $0x18] sm:$0xff] (!%p1688_p7)  ;;  %v864_v60 = vmax.f32 (!%p1688_p7), %v856_v31, 1e-24  ;;  %v1894_v28 = vpack.c.bf16 (!%p1688_p7), %v1015_v22, %v1014_v1 }
 0x1e2   : > { %841 = vst [vmem:[#allocation2 + $0x58] sm:$0xff] %v825_v61  ;;  %833 = vst [vmem:[#allocation2 + $0x18] sm:$0xff] %v817_v62  ;;  %v779_v4 = vpop.f32.mrb[4].mxu0  ;;  %v803_v5 = vpop.f32.mrb[4].mxu1  ;;  %v1884_v61 = vpack.c.bf16 (!%p1688_p7), %v993_v53, %v992_v52  ;;  %v1026_v62 = vld [vmem:[#allocation10 + $0x18] sm:$0xff] (!%p1688_p7)  ;;  %1883 = vmatprep.subr.bf16.mxu0 (!%p1688_p7), %v1882_v50  ;;  %2160 = vrsqrt.f32 (!%p1688_p7), %v865_v49  ;;  %v1032_v31 = vld [vmem:[#allocation10 + $0x48] sm:$0xff] (!%p1688_p7) }
 0x1e3   : > { %v818_v6 = vadd.f32 %v779_v4, %v689_v63  ;;  %v826_v7 = vadd.f32 %v803_v5, %v697_v0  ;;  %v805_v8 = vpop.f32.mrb[5].mxu1  ;;  %v781_v11 = vpop.f32.mrb[5].mxu0  ;;  %v1010_v63 = vld [vmem:[#allocation9 + $0xa0] sm:$0xff] (!%p1688_p7)  ;;  %v1011_v0 = vld [vmem:[#allocation9 + $0xa8] sm:$0xff] (!%p1688_p7)  ;;  %1915 = vmatprep.subr.bf16.mxu1 (!%p1688_p7), %v1914_v51  ;;  %2162 = vrsqrt.f32 (!%p1688_p7), %v864_v60  ;;  %v1016_v34 = vld [vmem:[#allocation9 + $0xd0] sm:$0xff] (!%p1688_p7)  ;;  %v1928_v37 = vpack.c.bf16 (!%p1688_p7), %v1032_v31, %v1031_v30 }
 0x1e4   : > { %v827_v12 = vadd.f32 %v805_v8, %v698_v2  ;;  %v819_v13 = vadd.f32 %v781_v11, %v690_v3  ;;  %849 = sbr.rel (%p1688_p7) target bundleno = 1107 (0x453), region = 84  ;;  %v1916_v2 = vpack.c.bf16 (!%p1688_p7), %v1026_v62, %v1025_v56  ;;  %v1886_v3 = vpack.c.bf16 (!%p1688_p7), %v1011_v0, %v1010_v63  ;;  %v1043_v4 = vld [vmem:[#allocation10 + $0xa0] sm:$0xff] (!%p1688_p7)  ;;  %v1044_v5 = vld [vmem:[#allocation10 + $0xa8] sm:$0xff] (!%p1688_p7)  ;;  %1885 = vmatpush3.bf16.msra.mxu0 (!%p1688_p7), %v1884_v61  ;;  %v1017_v36 = vld [vmem:[#allocation9 + $0xd8] sm:$0xff] (!%p1688_p7) }
 0x1e5   : > { %834 = vst [vmem:[#allocation2 + $0x20] sm:$0xff] %v818_v6  ;;  %842 = vst [vmem:[#allocation2 + $0x60] sm:$0xff] %v826_v7  ;;  %v994_v6 = vld [vmem:[#allocation9 + $0x20] sm:$0xff] (!%p1688_p7)  ;;  %v1918_v7 = vpack.c.bf16 (!%p1688_p7), %v1044_v5, %v1043_v4  ;;  %v995_v8 = vld [vmem:[#allocation9 + $0x28] sm:$0xff] (!%p1688_p7)  ;;  %v1898_v42 = vpack.c.bf16 (!%p1688_p7), %v1017_v36, %v1016_v34 }
 0x1e6   : > { %843 = vst [vmem:[#allocation2 + $0x68] sm:$0xff] %v827_v12  ;;  %835 = vst [vmem:[#allocation2 + $0x28] sm:$0xff] %v819_v13  ;;  %v785_v47 = vpop.f32.mrb[6].mxu0  ;;  %v809_v57 = vpop.f32.mrb[6].mxu1  ;;  %v1027_v11 = vld [vmem:[#allocation10 + $0x20] sm:$0xff] (!%p1688_p7)  ;;  %v1028_v12 = vld [vmem:[#allocation10 + $0x28] sm:$0xff] (!%p1688_p7)  ;;  %1917 = vmatpush3.bf16.msra.mxu1 (!%p1688_p7), %v1916_v2  ;;  %1887 = vmatprep.subr.bf16.mxu0 (!%p1688_p7), %v1886_v3 }
 0x1e7   : > { %v820_v58 = vadd.f32 %v785_v47, %v691_v14  ;;  %v828_v9 = vadd.f32 %v809_v57, %v699_v15  ;;  %v811_v54 = vpop.f32.mrb[7].mxu1  ;;  %v787_v10 = vpop.f32.mrb[7].mxu0  ;;  %v1888_v14 = vpack.c.bf16 (!%p1688_p7), %v995_v8, %v994_v6  ;;  %v1012_v15 = vld [vmem:[#allocation9 + $0xb0] sm:$0xff] (!%p1688_p7)  ;;  %v1920_v57 = vpack.c.bf16 (!%p1688_p7), %v1028_v12, %v1027_v11  ;;  %1919 = vmatprep.subr.bf16.mxu1 (!%p1688_p7), %v1918_v7  ;;  %v1050_v39 = vld [vmem:[#allocation10 + $0xd8] sm:$0xff] (!%p1688_p7)  ;;  %v1018_v50 = vld [vmem:[#allocation9 + $0xe0] sm:$0xff] (!%p1688_p7) }
 0x1e8   : > { %v829_v16 = vadd.f32 %v811_v54, %v700_v17  ;;  %v821_v19 = vadd.f32 %v787_v10, %v692_v18  ;;  %v2149_v13 = vpop.eup (!%p1688_p7), %2148  ;;  %v1013_v17 = vld [vmem:[#allocation9 + $0xb8] sm:$0xff] (!%p1688_p7)  ;;  %v1045_v18 = vld [vmem:[#allocation10 + $0xb0] sm:$0xff] (!%p1688_p7)  ;;  %v1019_v51 = vld [vmem:[#allocation9 + $0xe8] sm:$0xff] (!%p1688_p7) }
 0x1e9   : > { %836 = vst [vmem:[#allocation2 + $0x30] sm:$0xff] %v820_v58  ;;  %844 = vst [vmem:[#allocation2 + $0x70] sm:$0xff] %v828_v9  ;;  %v2151_v47 = vpop.eup (!%p1688_p7), %2150  ;;  %902 = vperm.xlu1 (!%p1688_p7), %2147, %v2149_v13   ;;  %v1046_v58 = vld [vmem:[#allocation10 + $0xb8] sm:$0xff] (!%p1688_p7)  ;;  %v996_v9 = vld [vmem:[#allocation9 + $0x30] sm:$0xff] (!%p1688_p7)  ;;  %1889 = vmatpush3.bf16.msra.mxu0 (!%p1688_p7), %v1888_v14  ;;  %v1902_v53 = vpack.c.bf16 (!%p1688_p7), %v1019_v51, %v1018_v50 }
 0x1ea   : > { %845 = vst [vmem:[#allocation2 + $0x78] sm:$0xff] %v829_v16  ;;  %837 = vst [vmem:[#allocation2 + $0x38] sm:$0xff] %v821_v19  ;;  %v997_v54 = vld [vmem:[#allocation9 + $0x38] sm:$0xff] (!%p1688_p7)  ;;  %v2153_v10 = vpop.eup (!%p1688_p7), %2152  ;;  %892 = vperm.xlu0 (!%p1688_p7), %2146, %v2151_v47   ;;  %v1890_v16 = vpack.c.bf16 (!%p1688_p7), %v1013_v17, %v1012_v15  ;;  %v1029_v19 = vld [vmem:[#allocation10 + $0x30] sm:$0xff] (!%p1688_p7)  ;;  %v1922_v20 = vpack.c.bf16 (!%p1688_p7), %v1046_v58, %v1045_v18  ;;  %1921 = vmatpush3.bf16.msra.mxu1 (!%p1688_p7), %v1920_v57 }
 0x1eb   : > { %v2155_v59 = vpop.eup %2154  ;;  %v1892_v21 = vpack.c.bf16 %v997_v54, %v996_v9  ;;  %v1924_v23 = vpack.c.bf16 %v1030_v55, %v1029_v19  ;;  %v1049_v38 = vld [vmem:[#allocation10 + $0xd0] sm:$0xff]  ;;  %v1001_v43 = vld [vmem:[#allocation9 + $0x58] sm:$0xff]  ;;  %v1051_v56 = vld [vmem:[#allocation10 + $0xe0] sm:$0xff]  ;;  %v948_v54 = vlaneseq }
 0x1ec   : > { %v2157_v27 = vpop.eup %2156  ;;  %1891 = vmatprep.subr.bf16.mxu0 %v1890_v16  ;;  %1923 = vmatprep.subr.bf16.mxu1 %v1922_v20  ;;  %v1000_v40 = vld [vmem:[#allocation9 + $0x50] sm:$0xff]  ;;  %v1034_v45 = vld [vmem:[#allocation10 + $0x58] sm:$0xff]  ;;  %v1930_v48 = vpack.c.bf16 %v1050_v39, %v1049_v38  ;;  %v1052_v60 = vld [vmem:[#allocation10 + $0xe8] sm:$0xff] }
 0x1ed   : > { %907 = vperm.xlu1 %2147, %v2153_v10   ;;  %v2159_v32 = vpop.eup %2158  ;;  %1893 = vmatpush3.bf16.msra.mxu0 %v1892_v21  ;;  %v1033_v44 = vld [vmem:[#allocation10 + $0x50] sm:$0xff]  ;;  %v1900_v49 = vpack.c.bf16 %v1001_v43, %v1000_v40  ;;  %v1002_v61 = vld [vmem:[#allocation9 + $0x60] sm:$0xff]  ;;  %v1934_v62 = vpack.c.bf16 %v1052_v60, %v1051_v56  ;;  %v1003_v63 = vld [vmem:[#allocation9 + $0x68] sm:$0xff]  ;;  %v3032_v10 = vshrl.u32 %v948_v54, 7 }
 0x1ee   : > { %897 = vperm.xlu0 %2146, %v2155_v59   ;;  %1925 = vmatpush3.bf16.msra.mxu1 %v1924_v23  ;;  %v2161_v41 = vpop.eup %2160  ;;  %v1932_v52 = vpack.c.bf16 %v1034_v45, %v1033_v44  ;;  %v1035_v0 = vld [vmem:[#allocation10 + $0x60] sm:$0xff]  ;;  %v1036_v2 = vld [vmem:[#allocation10 + $0x68] sm:$0xff]  ;;  %v1904_v3 = vpack.c.bf16 %v1003_v63, %v1002_v61  ;;  %v1020_v4 = vld [vmem:[#allocation9 + $0xf0] sm:$0xff] }
 0x1ef   : > { %1895 = vmatprep.subr.bf16.mxu0 %v1894_v28  ;;  %v2163_v46 = vpop.eup %2162  ;;  %1927 = vmatprep.subr.bf16.mxu1 %v1926_v33  ;;  %v1021_v5 = vld [vmem:[#allocation9 + $0xf8] sm:$0xff]  ;;  %v1936_v6 = vpack.c.bf16 %v1036_v2, %v1035_v0  ;;  %v1053_v8 = vld [vmem:[#allocation10 + $0xf0] sm:$0xff]  ;;  %v1279_v57 = vld [vmem:[#allocation12 + $0x8] sm:$0xff]  ;;  %v950_v16 = vsub.s32 0, %v3032_v10  ;;  %v954_v19 = vsub.s32 1, %v3032_v10 }
 0x1f0   : > { %v1906_v7 = vpack.c.bf16 %v1021_v5, %v1020_v4  ;;  %v1054_v11 = vld [vmem:[#allocation10 + $0xf8] sm:$0xff]  ;;  %v1004_v12 = vld [vmem:[#allocation9 + $0x70] sm:$0xff]  ;;  %v946_v55 = vld [vmem:[%s3197_s2] sm:$0x3] }
 0x1f1   : > { %917 = vperm.xlu1 %2147, %v2157_v27   ;;  %1897 = vmatpush3.bf16.msra.mxu0 %v1896_v35  ;;  %v1938_v13 = vpack.c.bf16 %v1054_v11, %v1053_v8  ;;  %v1005_v14 = vld [vmem:[#allocation9 + $0x78] sm:$0xff]  ;;  %v1037_v15 = vld [vmem:[#allocation10 + $0x70] sm:$0xff]  ;;  %v879_v59 = vld [vmem:[#allocation2 + $0x28] sm:$0xff]  ;;  %v3041_v1 = vrot.slane %v946_v55, %v950_v16  ;;  %v3045_v22 = vrot.slane %v946_v55, %v954_v19 }
 0x1f2   : > { %912 = vperm.xlu0 %2146, %v2159_v32   ;;  %1929 = vmatpush3.bf16.msra.mxu1 %v1928_v37  ;;  %v1038_v17 = vld [vmem:[#allocation10 + $0x78] sm:$0xff]  ;;  %v1908_v18 = vpack.c.bf16 %v1005_v14, %v1004_v12  ;;  %v874_v20 = vld [vmem:[#allocation2] sm:$0xff]  ;;  %v875_v21 = vld [vmem:[#allocation2 + $0x8] sm:$0xff] }
 0x1f3   : > { %1899 = vmatprep.subr.bf16.mxu0 %v1898_v42  ;;  %1931 = vmatprep.subr.bf16.mxu1 %v1930_v48  ;;  %v1940_v47 = vpack.c.bf16 %v1038_v17, %v1037_v15  ;;  %v1281_v58 = vld [vmem:[#allocation12 + $0x18] sm:$0xff]  ;;  %v876_v28 = vld [vmem:[#allocation2 + $0x10] sm:$0xff]  ;;  %v878_v30 = vld [vmem:[#allocation2 + $0x20] sm:$0xff] }
 0x1f4   : > { %v1942_v9 = vpack.c.bf16 %v1281_v58, %v1279_v57  ;;  %v877_v29 = vld [vmem:[#allocation2 + $0x18] sm:$0xff]  ;;  %v880_v42 = vld [vmem:[#allocation2 + $0x30] sm:$0xff]  ;;  %v883_v45 = vld [vmem:[#allocation2 + $0x48] sm:$0xff] }
 0x1f5   : > { %927 = vperm.xlu1 %2147, %v2161_v41   ;;  %1901 = vmatpush3.bf16.msra.mxu0 %v1900_v49  ;;  %v881_v38 = vld [vmem:[#allocation2 + $0x38] sm:$0xff]  ;;  %v882_v50 = vld [vmem:[#allocation2 + $0x40] sm:$0xff]  ;;  %v1283_v61 = vld [vmem:[#allocation12 + $0x28] sm:$0xff] }
 0x1f6   : > { %922 = vperm.xlu0 %2146, %v2163_v46   ;;  %1933 = vmatpush3.bf16.msra.mxu1 %v1932_v52  ;;  %v1278_v52 = vld [vmem:[#allocation12] sm:$0xff]  ;;  %v885_v56 = vld [vmem:[#allocation2 + $0x58] sm:$0xff]  ;;  %v884_v5 = vld [vmem:[#allocation2 + $0x50] sm:$0xff] }
 0x1f7   : > { %1903 = vmatprep.subr.bf16.mxu0 %v1902_v53  ;;  %1935 = vmatprep.subr.bf16.mxu1 %v1934_v62  ;;  %v1280_v53 = vld [vmem:[#allocation12 + $0x10] sm:$0xff]  ;;  %v1285_v62 = vld [vmem:[#allocation12 + $0x38] sm:$0xff]  ;;  %v887_v11 = vld [vmem:[#allocation2 + $0x68] sm:$0xff] }
 0x1f8   : > { %v1946_v8 = vpack.c.bf16 %v1285_v62, %v1283_v61  ;;  %v1284_v14 = vld [vmem:[#allocation12 + $0x30] sm:$0xff]  ;;  %v1287_v17 = vld [vmem:[#allocation12 + $0x48] sm:$0xff]  ;;  %v886_v55 = vld [vmem:[#allocation2 + $0x60] sm:$0xff] }
 0x1f9   : > { %1905 = vmatpush3.bf16.msra.mxu0 %v1904_v3  ;;  %v1944_v3 = vpack.c.bf16 %v1280_v53, %v1278_v52  ;;  %v1299_v52 = vld [vmem:[#allocation12 + $0xa8] sm:$0xff]  ;;  %v1301_v53 = vld [vmem:[#allocation12 + $0xb8] sm:$0xff]  ;;  %v1298_v62 = vld [vmem:[#allocation12 + $0xa0] sm:$0xff] }
 0x1fa   : > { %1937 = vmatpush3.bf16.msra.mxu1 %v1936_v6  ;;  %1907 = vmatprep.subr.bf16.mxu0 %v1906_v7  ;;  %v1962_v61 = vpack.c.bf16 %v1301_v53, %v1299_v52 }
 0x1fb   : > { %1939 = vmatprep.subr.bf16.mxu1 %v1938_v13  ;;  %v1282_v13 = vld [vmem:[#allocation12 + $0x20] sm:$0xff] }
 0x1fd   : > { %1909 = vmatpush3.bf16.msra.mxu0 %v1908_v18  ;;  %v1289_v18 = vld [vmem:[#allocation12 + $0x58] sm:$0xff] }
 0x1fe   : > { %1941 = vmatpush3.bf16.msra.mxu1 %v1940_v47  ;;  %1943 = vmatprep.subr.bf16.mxu0 %v1942_v9 }
 0x1ff   : > { %2006 = vmatprep.subr.bf16.mxu1 %v1942_v9 }
 0x268   : > { %v903_v23 = vpop.permute.xlu1 %902 }
 0x269   : > { %v893_v24 = vpop.permute.xlu0 %892  ;;  %v935_v25 = vmul.f32 %v903_v23, %v879_v59  ;;  %v934_v37 = vmul.f32 %v903_v23, %v878_v30 }
 0x26a   : > { %v930_v26 = vmul.f32 %v893_v24, %v874_v20  ;;  %v931_v27 = vmul.f32 %v893_v24, %v875_v21  ;;  %v1948_v20 = vpack.c.bf16 %v1284_v14, %v1282_v13  ;;  %v889_v21 = vld [vmem:[#allocation2 + $0x78] sm:$0xff]  ;;  %v1950_v24 = vpack.c.bf16 %v1289_v18, %v1287_v17 }
 0x26b   : > { %v963_v34 = vadd.f32 %v3045_v22, %v935_v25  ;;  %v962_v44 = vadd.f32 %v3041_v1, %v934_v37  ;;  %v1286_v25 = vld [vmem:[#allocation12 + $0x40] sm:$0xff]  ;;  %v1309_v17 = vld [vmem:[#allocation12 + $0xf8] sm:$0xff] }
 0x26c   : > { %v958_v31 = vadd.f32 %v3041_v1, %v930_v26  ;;  %v959_v32 = vadd.f32 %v3045_v22, %v931_v27  ;;  %v908_v41 = vpop.permute.xlu1 %907  ;;  %v1288_v26 = vld [vmem:[#allocation12 + $0x50] sm:$0xff]  ;;  %v1291_v27 = vld [vmem:[#allocation12 + $0x68] sm:$0xff]  ;;  %v1290_v37 = vld [vmem:[#allocation12 + $0x60] sm:$0xff] }
 0x26d   : > { %v898_v33 = vpop.permute.xlu0 %897  ;;  %v937_v43 = vmul.f32 %v908_v41, %v881_v38  ;;  %v936_v48 = vmul.f32 %v908_v41, %v880_v42  ;;  %v1292_v38 = vld [vmem:[#allocation12 + $0x70] sm:$0xff]  ;;  %v1297_v41 = vld [vmem:[#allocation12 + $0x98] sm:$0xff] }
 0x26e   : > { %v932_v35 = vmul.f32 %v898_v33, %v876_v28  ;;  %v933_v36 = vmul.f32 %v898_v33, %v877_v29  ;;  %2164 = vtanh.f32 %v958_v31  ;;  %v1293_v28 = vld [vmem:[#allocation12 + $0x78] sm:$0xff] }
 0x26f   : > { %2166 = vtanh.f32 %v959_v32  ;;  %v965_v49 = vadd.f32 %v3045_v22, %v937_v43  ;;  %v964_v0 = vadd.f32 %v3041_v1, %v936_v48  ;;  %v888_v32 = vld [vmem:[#allocation2 + $0x70] sm:$0xff] }
 0x270   : > { %v960_v39 = vadd.f32 %v3041_v1, %v932_v35  ;;  %v961_v40 = vadd.f32 %v3045_v22, %v933_v36  ;;  %2168 = vtanh.f32 %v963_v34  ;;  %v918_v60 = vpop.permute.xlu1 %917  ;;  %v1952_v35 = vpack.c.bf16 %v1288_v26, %v1286_v25 }
 0x271   : > { %v913_v46 = vpop.permute.xlu0 %912  ;;  %v941_v6 = vmul.f32 %v918_v60, %v885_v56  ;;  %v940_v57 = vmul.f32 %v918_v60, %v884_v5  ;;  %v1954_v36 = vpack.c.bf16 %v1293_v28, %v1291_v27 }
 0x272   : > { %2170 = vtanh.f32 %v960_v39  ;;  %v939_v51 = vmul.f32 %v913_v46, %v883_v45  ;;  %v938_v2 = vmul.f32 %v913_v46, %v882_v50  ;;  %v1956_v45 = vpack.c.bf16 %v1292_v38, %v1290_v37  ;;  %v1296_v50 = vld [vmem:[#allocation12 + $0x90] sm:$0xff] }
 0x273   : > { %2172 = vtanh.f32 %v961_v40  ;;  %v969_v54 = vadd.f32 %v3045_v22, %v941_v6  ;;  %v968_v30 = vadd.f32 %v3041_v1, %v940_v57  ;;  %v1295_v40 = vld [vmem:[#allocation12 + $0x88] sm:$0xff]  ;;  %v1302_v6 = vld [vmem:[#allocation12 + $0xc0] sm:$0xff]  ;;  %v1308_v57 = vld [vmem:[#allocation12 + $0xf0] sm:$0xff] }
 0x274   : > { %2174 = vtanh.f32 %v962_v44  ;;  %v967_v7 = vadd.f32 %v3045_v22, %v939_v51  ;;  %v966_v58 = vadd.f32 %v3041_v1, %v938_v2  ;;  %v928_v23 = vpop.permute.xlu1 %927  ;;  %v1958_v48 = vpack.c.bf16 %v1297_v41, %v1295_v40  ;;  %v1303_v2 = vld [vmem:[#allocation12 + $0xc8] sm:$0xff] }
 0x275   : > { %2176 = vtanh.f32 %v965_v49  ;;  %v923_v12 = vpop.permute.xlu0 %922  ;;  %v945_v33 = vmul.f32 %v928_v23, %v889_v21  ;;  %v944_v42 = vmul.f32 %v928_v23, %v888_v32  ;;  %v1294_v49 = vld [vmem:[#allocation12 + $0x80] sm:$0xff] }
 0x276   : > { %2178 = vtanh.f32 %v964_v0  ;;  %v943_v59 = vmul.f32 %v923_v12, %v887_v11  ;;  %v942_v31 = vmul.f32 %v923_v12, %v886_v55  ;;  %v3073_v21 = vld [vmem:[%s3240_s17] ss:$0 sm:$0xff] }
 0x277   : > { %2180 = vtanh.f32 %v967_v7  ;;  %v973_v44 = vadd.f32 %v3045_v22, %v945_v33  ;;  %v972_v56 = vadd.f32 %v3041_v1, %v944_v42  ;;  %v1304_v7 = vld [vmem:[#allocation12 + $0xd0] sm:$0xff] }
 0x278   : > { %v2165_v63 = vpop.eup %2164  ;;  %2182 = vtanh.f32 %v966_v58  ;;  %v971_v34 = vadd.f32 %v3045_v22, %v943_v59  ;;  %v970_v43 = vadd.f32 %v3041_v1, %v942_v31  ;;  %v1960_v22 = vpack.c.bf16 %v1296_v50, %v1294_v49  ;;  %v3068_v59 = vld [vmem:[%s3199_s4] ss:$0 sm:$0xff] }
 0x279   : > { %v2167_v4 = vpop.eup %2166  ;;  %2184 = vtanh.f32 %v969_v54  ;;  %v1968_v11 = vpack.c.bf16 %v1304_v7, %v1302_v6 }
 0x27a   : > { %1126 = vmatprep.mubr.f32.mxu0 %v2167_v4  ;;  %1237 = vmatprep.mubr.f32.mxu1 %v2167_v4  ;;  %v2169_v15 = vpop.eup %2168  ;;  %2186 = vtanh.f32 %v968_v30 }
 0x27b   : > { %1127 = vmatmul.mubr.f32.vlgmr.msra.gmra.mrb[0].mxu0 %v2165_v63  ;;  %1238 = vmatmul.mubr.f32.vlgmr.msra.gmra.mrb[0].mxu1 %v2165_v63  ;;  %2188 = vtanh.f32 %v971_v34  ;;  %v1300_v63 = vld [vmem:[#allocation12 + $0xb0] sm:$0xff] }
 0x27c   : > { %v2171_v47 = vpop.eup %2170  ;;  %1945 = vmatpush1.bf16.msra.mxu0 %v1944_v3  ;;  %2014 = vmatpush1.bf16.msra.mxu1 %v1944_v3  ;;  %2190 = vtanh.f32 %v970_v43  ;;  %v1305_v3 = vld [vmem:[#allocation12 + $0xd8] sm:$0xff]  ;;  %v1964_v1 = vpack.c.bf16 %v1300_v63, %v1298_v62 }
 0x27d   : > { %v2173_v9 = vpop.eup %2172  ;;  %1947 = vmatprep.subr.bf16.mxu0 %v1946_v8  ;;  %2007 = vmatprep.subr.bf16.mxu1 %v1946_v8  ;;  %2192 = vtanh.f32 %v973_v44  ;;  %v1966_v5 = vpack.c.bf16 %v1305_v3, %v1303_v2 }
 0x27e   : > { %1131 = vmatprep.mubr.f32.mxu0 %v2173_v9  ;;  %1242 = vmatprep.mubr.f32.mxu1 %v2173_v9  ;;  %v2175_v29 = vpop.eup %2174  ;;  %2194 = vtanh.f32 %v972_v56  ;;  %v2534_v9 = vmov 0.0  }
 0x27f   : > { %1132 = vmatmul.mubr.f32.gmra.mrb[2].mxu0 %v2171_v47  ;;  %1243 = vmatmul.mubr.f32.gmra.mrb[2].mxu1 %v2171_v47  ;;  %v2177_v39 = vpop.eup %2176  ;;  %v1306_v47 = vld [vmem:[#allocation12 + $0xe0] sm:$0xff] }
 0x280   : > { %1136 = vmatprep.mubr.f32.mxu0 %v2169_v15  ;;  %1247 = vmatprep.mubr.f32.mxu1 %v2169_v15  ;;  %v2179_v46 = vpop.eup %2178  ;;  %v1307_v15 = vld [vmem:[#allocation12 + $0xe8] sm:$0xff]  ;;  %v1972_v58 = vpack.c.bf16 %v1308_v57, %v1306_v47 }
 0x281   : > { %1949 = vmatpush1.bf16.msra.mxu0 %v1948_v20  ;;  %2015 = vmatpush1.bf16.msra.mxu1 %v1948_v20  ;;  %v2181_v51 = vpop.eup %2180  ;;  %v1970_v18 = vpack.c.bf16 %v1309_v17, %v1307_v15 }
 0x282   : > { %1951 = vmatprep.subr.bf16.mxu0 %v1950_v24  ;;  %2008 = vmatprep.subr.bf16.mxu1 %v1950_v24  ;;  %v2183_v60 = vpop.eup %2182 }
 0x283   : > { %1137 = vmatmul.mubr.f32.gmra.mrb[4].mxu0 %v2175_v29  ;;  %1248 = vmatmul.mubr.f32.gmra.mrb[4].mxu1 %v2175_v29  ;;  %v2185_v0 = vpop.eup %2184 }
 0x284   : > { %1141 = vmatprep.mubr.f32.mxu0 %v2177_v39  ;;  %1252 = vmatprep.mubr.f32.mxu1 %v2177_v39  ;;  %v2187_v4 = vpop.eup %2186 }
 0x285   : > { %1953 = vmatpush1.bf16.msra.mxu0 %v1952_v35  ;;  %2016 = vmatpush1.bf16.msra.mxu1 %v1952_v35  ;;  %v2189_v8 = vpop.eup %2188 }
 0x286   : > { %1955 = vmatprep.subr.bf16.mxu0 %v1954_v36  ;;  %2009 = vmatprep.subr.bf16.mxu1 %v1954_v36  ;;  %v2191_v12 = vpop.eup %2190 }
 0x287   : > { %1142 = vmatmul.mubr.f32.gmra.mrb[6].mxu0 %v2179_v46  ;;  %1253 = vmatmul.mubr.f32.gmra.mrb[6].mxu1 %v2179_v46  ;;  %v2193_v13 = vpop.eup %2192 }
 0x288   : > { %1146 = vmatprep.mubr.f32.mxu0 %v2181_v51  ;;  %1257 = vmatprep.mubr.f32.mxu1 %v2181_v51  ;;  %v2195_v14 = vpop.eup %2194 }
 0x289   : > { %1957 = vmatpush1.bf16.msra.mxu0 %v1956_v45  ;;  %2017 = vmatpush1.bf16.msra.mxu1 %v1956_v45 }
 0x28a   : > { %1959 = vmatprep.subr.bf16.mxu0 %v1958_v48  ;;  %2010 = vmatprep.subr.bf16.mxu1 %v1958_v48 }
 0x28b   : > { %1147 = vmatmul.mubr.f32.gmra.mrb[8].mxu0 %v2183_v60  ;;  %1258 = vmatmul.mubr.f32.gmra.mrb[8].mxu1 %v2183_v60 }
 0x28c   : > { %1151 = vmatprep.mubr.f32.mxu0 %v2185_v0  ;;  %1262 = vmatprep.mubr.f32.mxu1 %v2185_v0 }
 0x28d   : > { %1961 = vmatpush1.bf16.msra.mxu0 %v1960_v22  ;;  %2018 = vmatpush1.bf16.msra.mxu1 %v1960_v22 }
 0x28e   : > { %1963 = vmatprep.subr.bf16.mxu0 %v1962_v61  ;;  %2011 = vmatprep.subr.bf16.mxu1 %v1962_v61 }
 0x28f   : > { %1152 = vmatmul.mubr.f32.gmra.mrb[10].mxu0 %v2187_v4  ;;  %1263 = vmatmul.mubr.f32.gmra.mrb[10].mxu1 %v2187_v4 }
 0x290   : > { %1156 = vmatprep.mubr.f32.mxu0 %v2189_v8  ;;  %1267 = vmatprep.mubr.f32.mxu1 %v2189_v8 }
 0x291   : > { %1965 = vmatpush1.bf16.msra.mxu0 %v1964_v1  ;;  %2019 = vmatpush1.bf16.msra.mxu1 %v1964_v1 }
 0x292   : > { %1967 = vmatprep.subr.bf16.mxu0 %v1966_v5  ;;  %2012 = vmatprep.subr.bf16.mxu1 %v1966_v5 }
 0x293   : > { %1157 = vmatmul.mubr.f32.gmra.mrb[12].mxu0 %v2191_v12  ;;  %1268 = vmatmul.mubr.f32.gmra.mrb[12].mxu1 %v2191_v12 }
 0x294   : > { %1161 = vmatprep.mubr.f32.mxu0 %v2193_v13  ;;  %1272 = vmatprep.mubr.f32.mxu1 %v2193_v13 }
 0x295   : > { %1969 = vmatpush1.bf16.msra.mxu0 %v1968_v11  ;;  %2020 = vmatpush1.bf16.msra.mxu1 %v1968_v11 }
 0x296   : > { %1971 = vmatprep.subr.bf16.mxu0 %v1970_v18  ;;  %2013 = vmatprep.subr.bf16.mxu1 %v1970_v18 }
 0x297   : > { %1162 = vmatmul.mubr.f32.gmra.mrb[14].mxu0 %v2195_v14  ;;  %1273 = vmatmul.mubr.f32.gmra.mrb[14].mxu1 %v2195_v14 }
 0x298   : > { %1386 = vmatprep.mubr.f32.mxu0 %v2534_v9  ;;  %1410 = vmatprep.mubr.f32.mxu1 %v2534_v9 }
 0x299   : > { %1973 = vmatpush1.bf16.msra.mxu0 %v1972_v58  ;;  %2021 = vmatpush1.bf16.msra.mxu1 %v1972_v58 }
 0x34e   : > { %v1734_v54 = vpop.f32.mrb[0].mxu0  ;;  %v1790_v55 = vpop.f32.mrb[0].mxu1 }
 0x34f   : > { %v1735_v20 = vpop.f32.mrb[1].mxu0  ;;  %v1791_v23 = vpop.f32.mrb[1].mxu1 }
 0x350   : > { %v1736_v24 = vadd.f32 %v1735_v20, %v1734_v54  ;;  %v1792_v25 = vadd.f32 %v1791_v23, %v1790_v55 }
 0x352   : > { %v1129_v26 = vadd.f32 %v1736_v24, %v3068_v59  ;;  %v1240_v27 = vadd.f32 %v1792_v25, %v3073_v21  ;;  %v1737_v28 = vpop.f32.mrb[2].mxu0  ;;  %v1793_v29 = vpop.f32.mrb[2].mxu1 }
 0x353   : > { %v1738_v30 = vpop.f32.mrb[3].mxu0  ;;  %v1794_v31 = vpop.f32.mrb[3].mxu1 }
 0x354   : > { %1451 = vst [vmem:[#allocation13] sm:$0xff] %v1129_v26  ;;  %1459 = vst [vmem:[#allocation14] sm:$0xff] %v1240_v27  ;;  %v1739_v32 = vadd.f32 %v1738_v30, %v1737_v28  ;;  %v1795_v33 = vadd.f32 %v1794_v31, %v1793_v29  ;;  %1387 = vmatmul.mubr.f32.vlgmr.msra.gmra.mrb[16].mxu0 %v1129_v26  ;;  %v1310_v26 = vld [vmem:[%s3241_s10] sm:$0x3] }
 0x355   : > { %1392 = vmatprep.mubr.f32.mxu0 %v2534_v9  ;;  %v1315_v27 = vrot.slane %v1310_v26, %v950_v16  ;;  %v3104_v28 = vrot.slane %v1310_v26, %v954_v19 }
 0x356   : > { %v1134_v34 = vadd.f32 %v1739_v32, %v3068_v59  ;;  %v1245_v35 = vadd.f32 %v1795_v33, %v3073_v21  ;;  %v1740_v36 = vpop.f32.mrb[4].mxu0  ;;  %v1796_v37 = vpop.f32.mrb[4].mxu1 }
 0x357   : > { %v1741_v38 = vpop.f32.mrb[5].mxu0  ;;  %v1797_v39 = vpop.f32.mrb[5].mxu1 }
 0x358   : > { %1452 = vst [vmem:[#allocation13 + $0x8] sm:$0xff] %v1134_v34  ;;  %1460 = vst [vmem:[#allocation14 + $0x8] sm:$0xff] %v1245_v35  ;;  %v1742_v40 = vadd.f32 %v1741_v38, %v1740_v36  ;;  %v1798_v41 = vadd.f32 %v1797_v39, %v1796_v37  ;;  %1393 = vmatmul.mubr.f32.gmra.mrb[18].mxu0 %v1134_v34 }
 0x359   : > { %1398 = vmatprep.mubr.f32.mxu0 %v2534_v9 }
 0x35a   : > { %v1139_v42 = vadd.f32 %v1742_v40, %v3068_v59  ;;  %v1250_v43 = vadd.f32 %v1798_v41, %v3073_v21  ;;  %v1743_v44 = vpop.f32.mrb[6].mxu0  ;;  %v1799_v45 = vpop.f32.mrb[6].mxu1 }
 0x35b   : > { %v1744_v46 = vpop.f32.mrb[7].mxu0  ;;  %v1800_v48 = vpop.f32.mrb[7].mxu1 }
 0x35c   : > { %1453 = vst [vmem:[#allocation13 + $0x10] sm:$0xff] %v1139_v42  ;;  %1461 = vst [vmem:[#allocation14 + $0x10] sm:$0xff] %v1250_v43  ;;  %v1745_v49 = vadd.f32 %v1744_v46, %v1743_v44  ;;  %v1801_v50 = vadd.f32 %v1800_v48, %v1799_v45  ;;  %1399 = vmatmul.mubr.f32.gmra.mrb[20].mxu0 %v1139_v42 }
 0x35d   : > { %1404 = vmatprep.mubr.f32.mxu0 %v2534_v9 }
 0x35e   : > { %v1144_v51 = vadd.f32 %v1745_v49, %v3068_v59  ;;  %v1255_v52 = vadd.f32 %v1801_v50, %v3073_v21  ;;  %v1746_v53 = vpop.f32.mrb[8].mxu0  ;;  %v1802_v56 = vpop.f32.mrb[8].mxu1 }
 0x35f   : > { %v1747_v22 = vpop.f32.mrb[9].mxu0  ;;  %v1803_v60 = vpop.f32.mrb[9].mxu1 }
 0x360   : > { %1454 = vst [vmem:[#allocation13 + $0x18] sm:$0xff] %v1144_v51  ;;  %1462 = vst [vmem:[#allocation14 + $0x18] sm:$0xff] %v1255_v52  ;;  %v1748_v61 = vadd.f32 %v1747_v22, %v1746_v53  ;;  %v1804_v62 = vadd.f32 %v1803_v60, %v1802_v56  ;;  %1405 = vmatmul.mubr.f32.gmra.mrb[22].mxu0 %v1144_v51 }
 0x362   : > { %v1149_v63 = vadd.f32 %v1748_v61, %v3068_v59  ;;  %v1260_v0 = vadd.f32 %v1804_v62, %v3073_v21  ;;  %v1749_v2 = vpop.f32.mrb[10].mxu0  ;;  %v1805_v3 = vpop.f32.mrb[10].mxu1 }
 0x363   : > { %v1750_v1 = vpop.f32.mrb[11].mxu0  ;;  %v1806_v4 = vpop.f32.mrb[11].mxu1 }
 0x364   : > { %1455 = vst [vmem:[#allocation13 + $0x20] sm:$0xff] %v1149_v63  ;;  %1463 = vst [vmem:[#allocation14 + $0x20] sm:$0xff] %v1260_v0  ;;  %v1751_v5 = vadd.f32 %v1750_v1, %v1749_v2  ;;  %v1807_v6 = vadd.f32 %v1806_v4, %v1805_v3  ;;  %1411 = vmatmul.mubr.f32.vlgmr.msra.gmra.mrb[16].mxu1 %v1149_v63 }
 0x365   : > { %1416 = vmatprep.mubr.f32.mxu1 %v2534_v9 }
 0x366   : > { %v1154_v7 = vadd.f32 %v1751_v5, %v3068_v59  ;;  %v1265_v8 = vadd.f32 %v1807_v6, %v3073_v21  ;;  %v1752_v11 = vpop.f32.mrb[12].mxu0  ;;  %v1808_v12 = vpop.f32.mrb[12].mxu1 }
 0x367   : > { %v1753_v13 = vpop.f32.mrb[13].mxu0  ;;  %v1809_v14 = vpop.f32.mrb[13].mxu1 }
 0x368   : > { %1456 = vst [vmem:[#allocation13 + $0x28] sm:$0xff] %v1154_v7  ;;  %1464 = vst [vmem:[#allocation14 + $0x28] sm:$0xff] %v1265_v8  ;;  %v1754_v15 = vadd.f32 %v1753_v13, %v1752_v11  ;;  %v1810_v17 = vadd.f32 %v1809_v14, %v1808_v12  ;;  %1417 = vmatmul.mubr.f32.gmra.mrb[18].mxu1 %v1154_v7 }
 0x369   : > { %1422 = vmatprep.mubr.f32.mxu1 %v2534_v9 }
 0x36a   : > { %v1159_v18 = vadd.f32 %v1754_v15, %v3068_v59  ;;  %v1270_v47 = vadd.f32 %v1810_v17, %v3073_v21  ;;  %v1755_v57 = vpop.f32.mrb[14].mxu0  ;;  %v1811_v58 = vpop.f32.mrb[14].mxu1 }
 0x36b   : > { %v1756_v54 = vpop.f32.mrb[15].mxu0  ;;  %v1812_v55 = vpop.f32.mrb[15].mxu1 }
 0x36c   : > { %1457 = vst [vmem:[#allocation13 + $0x30] sm:$0xff] %v1159_v18  ;;  %1465 = vst [vmem:[#allocation14 + $0x30] sm:$0xff] %v1270_v47  ;;  %v1757_v20 = vadd.f32 %v1756_v54, %v1755_v57  ;;  %v1813_v23 = vadd.f32 %v1812_v55, %v1811_v58  ;;  %1423 = vmatmul.mubr.f32.gmra.mrb[20].mxu1 %v1159_v18 }
 0x36d   : > { %1428 = vmatprep.mubr.f32.mxu1 %v2534_v9 }
 0x36e   : > { %v1164_v24 = vadd.f32 %v1757_v20, %v3068_v59  ;;  %v1275_v25 = vadd.f32 %v1813_v23, %v3073_v21 }
 0x370   : > { %1458 = vst [vmem:[#allocation13 + $0x38] sm:$0xff] %v1164_v24  ;;  %1466 = vst [vmem:[#allocation14 + $0x38] sm:$0xff] %v1275_v25  ;;  %1429 = vmatmul.mubr.f32.gmra.mrb[22].mxu1 %v1164_v24 }
 0x427   : > { %v1388_v29 = vpop.f32.mrb[16].mxu0 }
 0x428   : > { %v1389_v9 = vadd.f32 %v1388_v29, %v1315_v27  ;;  %v1390_v30 = vpop.f32.mrb[17].mxu0 }
 0x429   : > { %v1391_v59 = vadd.f32 %v1390_v30, %v3104_v28 }
 0x42a   : > { %2196 = vtanh.f32 %v1389_v9 }
 0x42b   : > { %2198 = vtanh.f32 %v1391_v59  ;;  %v1394_v21 = vpop.f32.mrb[18].mxu0 }
 0x42c   : > { %v1395_v31 = vadd.f32 %v1394_v21, %v1315_v27  ;;  %v1396_v32 = vpop.f32.mrb[19].mxu0 }
 0x42d   : > { %v1397_v33 = vadd.f32 %v1396_v32, %v3104_v28 }
 0x42e   : > { %2200 = vtanh.f32 %v1395_v31 }
 0x42f   : > { %2202 = vtanh.f32 %v1397_v33  ;;  %v1400_v34 = vpop.f32.mrb[20].mxu0 }
 0x430   : > { %v1401_v16 = vadd.f32 %v1400_v34, %v1315_v27  ;;  %v1402_v35 = vpop.f32.mrb[21].mxu0 }
 0x431   : > { %v1403_v10 = vadd.f32 %v1402_v35, %v3104_v28 }
 0x432   : > { %2204 = vtanh.f32 %v1401_v16 }
 0x433   : > { %2206 = vtanh.f32 %v1403_v10  ;;  %v1406_v19 = vpop.f32.mrb[22].mxu0 }
 0x434   : > { %v2197_v36 = vpop.eup %2196  ;;  %v1407_v37 = vadd.f32 %v1406_v19, %v1315_v27  ;;  %v1408_v38 = vpop.f32.mrb[23].mxu0 }
 0x435   : > { %v2199_v39 = vpop.eup %2198  ;;  %1467 = vst [vmem:[#allocation16] sm:$0xff] %v2197_v36  ;;  %v1409_v40 = vadd.f32 %v1408_v38, %v3104_v28 }
 0x436   : > { %1468 = vst [vmem:[#allocation16 + $0x8] sm:$0xff] %v2199_v39  ;;  %2208 = vtanh.f32 %v1407_v37 }
 0x437   : > { %2210 = vtanh.f32 %v1409_v40  ;;  %v1412_v41 = vpop.f32.mrb[16].mxu1 }
 0x438   : > { %v2201_v42 = vpop.eup %2200  ;;  %v1413_v43 = vadd.f32 %v1412_v41, %v1315_v27  ;;  %v1414_v44 = vpop.f32.mrb[17].mxu1 }
 0x439   : > { %v2203_v45 = vpop.eup %2202  ;;  %1469 = vst [vmem:[#allocation16 + $0x10] sm:$0xff] %v2201_v42  ;;  %v1415_v46 = vadd.f32 %v1414_v44, %v3104_v28 }
 0x43a   : > { %1470 = vst [vmem:[#allocation16 + $0x18] sm:$0xff] %v2203_v45  ;;  %2212 = vtanh.f32 %v1413_v43 }
 0x43b   : > { %2214 = vtanh.f32 %v1415_v46  ;;  %v1418_v48 = vpop.f32.mrb[18].mxu1 }
 0x43c   : > { %v2205_v49 = vpop.eup %2204  ;;  %v1419_v50 = vadd.f32 %v1418_v48, %v1315_v27  ;;  %v1420_v51 = vpop.f32.mrb[19].mxu1 }
 0x43d   : > { %v2207_v52 = vpop.eup %2206  ;;  %1471 = vst [vmem:[#allocation16 + $0x20] sm:$0xff] %v2205_v49  ;;  %v1421_v53 = vadd.f32 %v1420_v51, %v3104_v28 }
 0x43e   : > { %1472 = vst [vmem:[#allocation16 + $0x28] sm:$0xff] %v2207_v52  ;;  %2216 = vtanh.f32 %v1419_v50 }
 0x43f   : > { %2218 = vtanh.f32 %v1421_v53  ;;  %v1424_v56 = vpop.f32.mrb[20].mxu1 }
 0x440   : > { %v2209_v22 = vpop.eup %2208  ;;  %v1425_v60 = vadd.f32 %v1424_v56, %v1315_v27  ;;  %v1426_v61 = vpop.f32.mrb[21].mxu1 }
 0x441   : > { %v2211_v62 = vpop.eup %2210  ;;  %1473 = vst [vmem:[#allocation16 + $0x30] sm:$0xff] %v2209_v22  ;;  %v1427_v63 = vadd.f32 %v1426_v61, %v3104_v28 }
 0x442   : > { %1474 = vst [vmem:[#allocation16 + $0x38] sm:$0xff] %v2211_v62  ;;  %2220 = vtanh.f32 %v1425_v60 }
 0x443   : > { %2222 = vtanh.f32 %v1427_v63  ;;  %v1430_v0 = vpop.f32.mrb[22].mxu1 }
 0x444   : > { %v2213_v2 = vpop.eup %2212  ;;  %v1431_v3 = vadd.f32 %v1430_v0, %v1315_v27  ;;  %v1432_v1 = vpop.f32.mrb[23].mxu1 }
 0x445   : > { %v2215_v4 = vpop.eup %2214  ;;  %1475 = vst [vmem:[#allocation16 + $0x40] sm:$0xff] %v2213_v2  ;;  %v1433_v5 = vadd.f32 %v1432_v1, %v3104_v28 }
 0x446   : > { %1476 = vst [vmem:[#allocation16 + $0x48] sm:$0xff] %v2215_v4  ;;  %2224 = vtanh.f32 %v1431_v3 }
 0x447   : > { %2226 = vtanh.f32 %v1433_v5 }
 0x448   : > { %v2217_v6 = vpop.eup %2216 }
 0x449   : > { %v2219_v7 = vpop.eup %2218  ;;  %1477 = vst [vmem:[#allocation16 + $0x50] sm:$0xff] %v2217_v6 }
 0x44a   : > { %1478 = vst [vmem:[#allocation16 + $0x58] sm:$0xff] %v2219_v7 }
 0x44c   : > { %v2221_v8 = vpop.eup %2220 }
 0x44d   : > { %v2223_v11 = vpop.eup %2222  ;;  %1479 = vst [vmem:[#allocation16 + $0x60] sm:$0xff] %v2221_v8 }
 0x44e   : > { %1480 = vst [vmem:[#allocation16 + $0x68] sm:$0xff] %v2223_v11 }
 0x450   : > { %v2225_v12 = vpop.eup %2224 }
 0x451   : > { %v2227_v13 = vpop.eup %2226  ;;  %1481 = vst [vmem:[#allocation16 + $0x70] sm:$0xff] %v2225_v12 }
 0x452   : > { %1482 = vst [vmem:[#allocation16 + $0x78] sm:$0xff] %v2227_v13 }
 0x453 PF: > { %p2074_p9 = scmp.eq.s32.totalorder %s2631_s23, 1  ;;  %s2535_s16 = smov [#allocation14]  }
 0x454   : > { %s1508_s29 = sshll.u32 %s2535_s16, 4  ;;  %s1509_s29 = int_to_ptr.vmem [resolvable:$true] %s1508_s29 }
 0x455   : > { %s2372_s27 = scalar_lea.vmem %s1509_s29, 1024  ;;  %p2379_p1 = scmp.lt.s32.totalorder %s1509_s29, %s1509_s29 }
 0x456   : > { %p2373_p10 = scmp.ne.s32.totalorder %s1509_s29, %s2372_s27  ;;  %p2380_p3 = scmp.lt.s32.totalorder %s2372_s27, %s2372_s27 }
 0x458   : > { %p2374_p11 = pnand %p2373_p10, %p2074_p9  ;;  %p2381_p2 = por %p2380_p3, %p2379_p1 }
 0x45a   : > { %p2375_p5 = pneg %p2374_p11 }
 0x45c   : > { %p2382_p13 = pnand %p2381_p2, %p2375_p5 }
 0x45e   : > { %2385 = shalt.err (!%p2382_p13)
}
 0x45f   : > { %s3242_s24 = sld [smem:[#allocation29_spill]] }
 0x465   : > { %s2386_s30 = scalar_lea.hbm %s3242_s24, 1024 }
 0x466   : > { %p2387_p0 = scmp.ne.s32.totalorder %s3242_s24, %s2386_s30  ;;  %p2392_p12 = scmp.lt.u32.totalorder %s2386_s30, %s3242_s24 }
 0x468   : > { %p2388_p6 = pnand %p2387_p0, %p2074_p9 }
 0x46a   : > { %p2389_p8 = pneg %p2388_p6 }
 0x46c   : > { %p2394_p4 = pnand %p2392_p12, %p2389_p8 }
 0x46e   : > { %2397 = shalt.err (!%p2394_p4)
}
 0x46f   : > { %s2536_s25 = smov 128   ;;  %s2537_s26 = smov 8  }
 0x470   : > { %2041 = dma.vmem_to_hbm [thread:$0]  (%p2074_p9), %s1509_s29, 1024, %s3242_s24, [#allocation15], %s2536_s25, %s2536_s25, %s2537_s26  }
 0x471   : > { %s2538_s14 = smov [#allocation13]   ;;  %s2539_s9 = smov [#allocation16]  }
 0x472   : > { %s1492_s17 = sshll.u32 %s2538_s14, 4  ;;  %s1525_s0 = sshll.u32 %s2539_s9, 4  ;;  %s1493_s17 = int_to_ptr.vmem [resolvable:$true] %s1492_s17  ;;  %s1526_s0 = int_to_ptr.vmem [resolvable:$true] %s1525_s0 }
 0x473   : > { %s2398_s10 = scalar_lea.vmem %s1493_s17, 1024  ;;  %p2405_p5 = scmp.lt.s32.totalorder %s1493_s17, %s1493_s17 }
 0x474   : > { %p2399_p7 = scmp.ne.s32.totalorder %s1493_s17, %s2398_s10  ;;  %p2406_p1 = scmp.lt.s32.totalorder %s2398_s10, %s2398_s10 }
 0x476   : > { %p2400_p10 = pnand %p2399_p7, %p2074_p9  ;;  %p2407_p3 = por %p2406_p1, %p2405_p5 }
 0x478   : > { %p2401_p11 = pneg %p2400_p10 }
 0x47a   : > { %p2408_p2 = pnand %p2407_p3, %p2401_p11 }
 0x47c   : > { %2411 = shalt.err (!%p2408_p2)
}
 0x47d   : > { %s3243_s28 = sld [smem:[#allocation28_spill]] }
 0x483   : > { %s2412_s29 = scalar_lea.hbm %s3243_s28, 1024 }
 0x484   : > { %p2413_p13 = scmp.ne.s32.totalorder %s3243_s28, %s2412_s29  ;;  %p2418_p8 = scmp.lt.u32.totalorder %s2412_s29, %s3243_s28 }
 0x486   : > { %p2414_p0 = pnand %p2413_p13, %p2074_p9 }
 0x488   : > { %p2415_p6 = pneg %p2414_p0 }
 0x48a   : > { %p2420_p12 = pnand %p2418_p8, %p2415_p6 }
 0x48c   : > { %2423 = shalt.err (!%p2420_p12)
}
 0x48d   : > { %2039 = dma.vmem_to_hbm [thread:$0]  (%p2074_p9), %s1493_s17, 1024, %s3243_s28, [#allocation6], %s2536_s25, %s2536_s25, %s2537_s26  }
 0x48e   : > { %s2424_s3 = scalar_lea.vmem %s1526_s0, 2048  ;;  %p2431_p11 = scmp.lt.s32.totalorder %s1526_s0, %s1526_s0 }
 0x48f   : > { %p2425_p4 = scmp.ne.s32.totalorder %s1526_s0, %s2424_s3  ;;  %p2432_p5 = scmp.lt.s32.totalorder %s2424_s3, %s2424_s3 }
 0x491   : > { %p2426_p7 = pnand %p2425_p4, %p2074_p9  ;;  %p2433_p1 = por %p2432_p5, %p2431_p11 }
 0x493   : > { %p2427_p10 = pneg %p2426_p7 }
 0x495   : > { %p2434_p3 = pnand %p2433_p1, %p2427_p10 }
 0x497   : > { %2437 = shalt.err (!%p2434_p3)
}
 0x498   : > { %s3244_s9 = sld [smem:[#allocation30_spill]] }
 0x49e   : > { %s2438_s10 = scalar_lea.hbm %s3244_s9, 2048 }
 0x49f   : > { %p2439_p2 = scmp.ne.s32.totalorder %s3244_s9, %s2438_s10  ;;  %p2444_p6 = scmp.lt.u32.totalorder %s2438_s10, %s3244_s9 }
 0x4a1   : > { %p2440_p13 = pnand %p2439_p2, %p2074_p9 }
 0x4a3   : > { %p2441_p0 = pneg %p2440_p13 }
 0x4a5   : > { %p2446_p8 = pnand %p2444_p6, %p2441_p0 }
 0x4a7   : > { %2449 = shalt.err (!%p2446_p8)
}
 0x4a8   : > { %s2540_s17 = smov 256   ;;  %s2541_s29 = smov 16  }
 0x4a9   : > { %2043 = dma.vmem_to_hbm [thread:$0]  (%p2074_p9), %s1526_s0, 2048, %s3244_s9, [#allocation15], %s2540_s17, %s2540_s17, %s2541_s29  }
 0x4aa   : > { %2491 = dma.done.wait (%p2074_p9), [#allocation6], 1024  }
 0x4ab   : > { %2493 = vsyncadd (%p2074_p9), [#allocation6], 4294966272 }
 0x4ac   : > { %2495 = dma.done.wait (%p2074_p9), [#allocation15], 3072  }
 0x4ad   : > { %2497 = vsyncadd (%p2074_p9), [#allocation15], 4294964224 }
 0x4ae PF: > { %s31_s22 = sadd.s32 1, %s2520_s22   ;;  %s3245_s17 = smov %s2504_s18 }
 0x4af   : > { %p28_p12 = scmp.ge.s32.totalorder %s31_s22, 4   ;;  %s3246_s18 = smov %s2508_s19 }
 0x4b0   : > { %s3247_s19 = smov %s2798_s12  ;;  %s3248_s20 = smov %s2516_s21 }
 0x4b1   : > { %s3249_s21 = smov %s3251_s8  ;;  %30 = sbr.rel (!%p28_p12) target bundleno = 18 (0x12), region = 145 }
 0x4b8   :  { %1549 = vsyncpa [#allocation5], 1 }
 0x4b9   :  { %1551 = vsyncpa [#allocation5 + $0x1], 1 }
 0x4ba   :  { %1552 = vsyncpa [#allocation8], 1 }
 0x4bb   :  { %1554 = vsyncpa [#allocation8 + $0x1], 1 }
 0x4bc   :  { %1555 = vsyncpa [#allocation11], 1 }
 0x4bd   :  { %1556 = vsyncpa [#allocation6], 1 }
 0x4be   :  { %1558 = vsyncpa [#allocation6 + $0x1], 1 }
 0x4bf   :  { %1559 = vsyncpa [#allocation15], 1 }

</bundles_post_ra>
